<compile_context>
chip_gen: v7x
topology: tpu7x:2x2x1
jax: 0.10.0
libtpu: 0.0.40
codegen_flags: <defaults>
</compile_context>

<pallas_src>
import jax
import jax.numpy as jnp
import numpy as np
from jax.experimental import pallas as pl
from jax.experimental.pallas import tpu as pltpu

BN_EPS = 1e-5
IN_DIM = 3 * 32 * 32      # 3072
OUT_PAD = 128             # Linear(128,10) padded to 128 lanes for dense vst
TM_MAX = 512              # max batch rows per grid step


def _round_up(x, m):
    return ((x + m - 1) // m) * m


def _use_encoder_fold():
    """Fold encoder(3072,64) into Linear(64,256) only on 256-wide-MXU chips (v6e/v7x).

    On v5e's 128-wide MXU a 64-col first matmul costs one pass over K=3072; folding to a
    256-col output would double the passes and risk flipping the kernel MXU-bound.
    """
    try:
        kind = jax.devices()[0].device_kind.lower()
    except Exception:
        return True
    return "v5" not in kind


def _kernel_folded(x_ref, w1_ref, b1_ref, w2_ref, b2_ref, w3_ref, b3_ref, o_ref):
    # x streams as f32; cast to bf16 in-kernel right before the MXU.
    xb = x_ref[...].astype(jnp.bfloat16)
    # [encoder(3072,64) . Linear(64,256) . BN1] folded on host -> single dot over K=3072.
    h = jnp.dot(xb, w1_ref[...], preferred_element_type=jnp.float32)
    h = jnp.maximum(h + b1_ref[...], 0.0)                # ReLU; Dropout(0.2)=id (eval)
    # Linear(256,128) [BN2 folded] -> ReLU
    h = jnp.dot(h.astype(jnp.bfloat16), w2_ref[...], preferred_element_type=jnp.float32)
    h = jnp.maximum(h + b2_ref[...], 0.0)
    # Linear(128,10) padded to 128 lane-dense output
    o_ref[...] = jnp.dot(h.astype(jnp.bfloat16), w3_ref[...],
                         preferred_element_type=jnp.float32) + b3_ref[...]


def _kernel_unfolded(x_ref, wenc_ref, benc_ref, w1_ref, b1_ref,
                     w2_ref, b2_ref, w3_ref, b3_ref, o_ref):
    xb = x_ref[...].astype(jnp.bfloat16)
    # stand-in 'ae' encoder bottleneck (MXU, bf16 in / f32 accumulate)
    f = jnp.dot(xb, wenc_ref[...], preferred_element_type=jnp.float32) + benc_ref[...]
    # Linear(64,256) [BN1 folded] -> ReLU
    h = jnp.dot(f.astype(jnp.bfloat16), w1_ref[...], preferred_element_type=jnp.float32)
    h = jnp.maximum(h + b1_ref[...], 0.0)
    # Linear(256,128) [BN2 folded] -> ReLU
    h = jnp.dot(h.astype(jnp.bfloat16), w2_ref[...], preferred_element_type=jnp.float32)
    h = jnp.maximum(h + b2_ref[...], 0.0)
    o_ref[...] = jnp.dot(h.astype(jnp.bfloat16), w3_ref[...],
                         preferred_element_type=jnp.float32) + b3_ref[...]


def _prepare_kernel_params(p, fold):
    """Host-side: fold BN into Linears, (optionally) fold encoder into Linear1,
    pad the final layer to 128 lanes, cast weights to bf16."""
    s1 = p["g1"] * jax.lax.rsqrt(p["rv1"] + BN_EPS)            # (1, 256)
    w1f = p["w1"] * s1                                         # (64, 256)
    b1f = (p["b1"] - p["rm1"]) * s1 + p["be1"]                 # (1, 256)

    s2 = p["g2"] * jax.lax.rsqrt(p["rv2"] + BN_EPS)            # (1, 128)
    w2f = p["w2"] * s2                                         # (256, 128)
    b2f = (p["b2"] - p["rm2"]) * s2 + p["be2"]                 # (1, 128)

    w3p = jnp.zeros((128, OUT_PAD), jnp.float32).at[:, :10].set(p["w3"])
    b3p = jnp.zeros((1, OUT_PAD), jnp.float32).at[:, :10].set(p["b3"])

    tail = (
        w2f.astype(jnp.bfloat16), b2f.astype(jnp.float32),
        w3p.astype(jnp.bfloat16), b3p.astype(jnp.float32),
    )
    if fold:
        w01 = p["wenc"] @ w1f                                  # (3072, 256) f32 on host
        b01 = p["benc"] @ w1f + b1f                            # (1, 256)
        return (w01.astype(jnp.bfloat16), b01.astype(jnp.float32)) + tail
    return (
        p["wenc"].astype(jnp.bfloat16), p["benc"].astype(jnp.float32),
        w1f.astype(jnp.bfloat16), b1f.astype(jnp.float32),
    ) + tail


def _pick_tm(n):
    tm = min(TM_MAX, _round_up(n, 16))      # 16: keeps bf16 (16,128) sublane tiling happy
    if n > 256:
        # ensure >= 2 grid steps so both v7x TensorCores get work
        tm = min(tm, _round_up((n + 1) // 2, 16))
    return tm


def cifar10_classifier_forward(x_nchw, params):
    """x_nchw: (N, 3, 32, 32) float32. Returns logits (N, 10) float32."""
    n = x_nchw.shape[0]
    x_flat = x_nchw.reshape(n, IN_DIM)        # free view for contiguous NCHW; stays f32

    tm = _pick_tm(n)
    n_pad = _round_up(n, tm)
    if n_pad != n:
        x_flat = jnp.pad(x_flat, ((0, n_pad - n), (0, 0)))

    fold = _use_encoder_fold()
    kparams = _prepare_kernel_params(params, fold)
    kernel = _kernel_folded if fold else _kernel_unfolded

    def resident(arr):
        # full-array block, constant index_map -> stays VMEM-resident across grid steps
        return pl.BlockSpec(arr.shape, lambda i: (0, 0))

    out = pl.pallas_call(
        kernel,
        out_shape=jax.ShapeDtypeStruct((n_pad, OUT_PAD), jnp.float32),
        grid=(n_pad // tm,),
        in_specs=[pl.BlockSpec((tm, IN_DIM), lambda i: (i, 0))]
                 + [resident(a) for a in kparams],
        out_specs=pl.BlockSpec((tm, OUT_PAD), lambda i: (i, 0)),
        compiler_params=pltpu.CompilerParams(
            dimension_semantics=("parallel",),
            vmem_limit_bytes=40 * 1024 * 1024,
        ),
    )(x_flat, *kparams)

    return out[:n, :10]


def init_params(key):
    """Deterministic parameter init (shapes from the module __init__, 'ae' branch)."""
    ks = jax.random.split(key, 12)

    def lin(k, fan_in, fan_out):
        bound = 1.0 / np.sqrt(fan_in)
        kw, kb = jax.random.split(k)
        w = jax.random.uniform(kw, (fan_in, fan_out), jnp.float32, -bound, bound)
        b = jax.random.uniform(kb, (1, fan_out), jnp.float32, -bound, bound)
        return w, b

    wenc, benc = lin(ks[0], IN_DIM, 64)          # stand-in AE bottleneck -> input_dim=64
    w1, b1 = lin(ks[1], 64, 256)
    w2, b2 = lin(ks[2], 256, 128)
    w3, b3 = lin(ks[3], 128, 10)

    def bn(kg, kb, km, kv, dim):
        g = 1.0 + 0.1 * jax.random.normal(kg, (1, dim), jnp.float32)
        be = 0.1 * jax.random.normal(kb, (1, dim), jnp.float32)
        rm = 0.1 * jax.random.normal(km, (1, dim), jnp.float32)
        rv = 1.0 + 0.1 * jax.random.uniform(kv, (1, dim), jnp.float32)
        return g, be, rm, rv

    g1, be1, rm1, rv1 = bn(ks[4], ks[5], ks[6], ks[7], 256)
    g2, be2, rm2, rv2 = bn(ks[8], ks[9], ks[10], ks[11], 128)

    return dict(
        wenc=wenc, benc=benc,
        w1=w1, b1=b1, g1=g1, be1=be1, rm1=rm1, rv1=rv1,
        w2=w2, b2=b2, g2=g2, be2=be2, rm2=rm2, rv2=rv2,
        w3=w3, b3=b3,
    )


def reference_forward(x_nchw, p):
    """Plain-JAX f32 reference (unfolded BN, eval mode) for sanity check."""
    n = x_nchw.shape[0]
    x = x_nchw.reshape(n, -1).astype(jnp.float32)
    f = x @ p["wenc"] + p["benc"]
    h = f @ p["w1"] + p["b1"]
    h = (h - p["rm1"]) / jnp.sqrt(p["rv1"] + BN_EPS) * p["g1"] + p["be1"]
    h = jnp.maximum(h, 0.0)
    h = h @ p["w2"] + p["b2"]
    h = (h - p["rm2"]) / jnp.sqrt(p["rv2"] + BN_EPS) * p["g2"] + p["be2"]
    h = jnp.maximum(h, 0.0)
    return h @ p["w3"] + p["b3"]


if __name__ == "__main__":
    key = jax.random.PRNGKey(0)
    k_x, k_p = jax.random.split(key)

    batch = 8
    x = jax.random.normal(k_x, (batch, 3, 32, 32), jnp.float32)   # NCHW, like PyTorch
    params = init_params(k_p)

    logits = cifar10_classifier_forward(x, params)
    logits = jax.block_until_ready(logits)

    ref = jax.block_until_ready(reference_forward(x, params))
    assert logits.shape == (batch, 10)
    assert bool(jnp.all(jnp.isfinite(logits)))
    # bf16 weights/activations with f32 accumulation (+ host-side weight folds)
    # vs full-f32 unfolded reference.
    np.testing.assert_allclose(np.asarray(logits), np.asarray(ref), rtol=5e-2, atol=5e-2)

    print("KERNEL_OK")
</pallas_src>

<mosaic_0001>
module attributes {stable_mosaic.version = 11 : i64} {
  func.func @_kernel_folded(%arg0: i32, %arg1: memref<16x3072xf32, #tpu.memory_space<vmem>>, %arg2: memref<3072x256xbf16, #tpu.memory_space<vmem>>, %arg3: memref<1x256xf32, #tpu.memory_space<vmem>>, %arg4: memref<256x128xbf16, #tpu.memory_space<vmem>>, %arg5: memref<1x128xf32, #tpu.memory_space<vmem>>, %arg6: memref<128x128xbf16, #tpu.memory_space<vmem>>, %arg7: memref<1x128xf32, #tpu.memory_space<vmem>>, %arg8: memref<16x128xf32, #tpu.memory_space<vmem>>) attributes {dimension_semantics = [#tpu.dimension_semantics<parallel>], iteration_bounds = array<i64: 1>, scalar_prefetch = 0 : i64, scratch_operands = 0 : i64, tpu.core_type = #tpu.core_type<tc>, window_params = [{transform_indices = @transform_0, window_bounds = array<i64: 16, 3072>}, {pipeline_mode = #tpu.pipeline_mode<synchronous>, transform_indices = @transform_1, window_bounds = array<i64: 3072, 256>}, {pipeline_mode = #tpu.pipeline_mode<synchronous>, transform_indices = @transform_2, window_bounds = array<i64: 1, 256>}, {pipeline_mode = #tpu.pipeline_mode<synchronous>, transform_indices = @transform_3, window_bounds = array<i64: 256, 128>}, {pipeline_mode = #tpu.pipeline_mode<synchronous>, transform_indices = @transform_4, window_bounds = array<i64: 1, 128>}, {pipeline_mode = #tpu.pipeline_mode<synchronous>, transform_indices = @transform_5, window_bounds = array<i64: 128, 128>}, {pipeline_mode = #tpu.pipeline_mode<synchronous>, transform_indices = @transform_6, window_bounds = array<i64: 1, 128>}, {transform_indices = @transform_7, window_bounds = array<i64: 16, 128>}]} {
    %c0 = arith.constant 0 : index
    %c0_0 = arith.constant 0 : index
    %0 = vector.load %arg1[%c0, %c0_0] : memref<16x3072xf32, #tpu.memory_space<vmem>>, vector<16x3072xf32>
    %1 = arith.truncf %0 : vector<16x3072xf32> to vector<16x3072xbf16>
    %c0_1 = arith.constant 0 : index
    %c0_2 = arith.constant 0 : index
    %2 = vector.load %arg2[%c0_1, %c0_2] : memref<3072x256xbf16, #tpu.memory_space<vmem>>, vector<3072x256xbf16>
    %cst = arith.constant dense<0.000000e+00> : vector<16x256xf32>
    %3 = tpu.matmul %1, %2, %cst {dimension_numbers = #tpu.dot_dimension_numbers<[1], [0], [0], [1], [0, 0, 1, 1], [], []>} : vector<16x3072xbf16>, vector<3072x256xbf16>, vector<16x256xf32> -> vector<16x256xf32>
    %c0_3 = arith.constant 0 : index
    %c0_4 = arith.constant 0 : index
    %4 = vector.load %arg3[%c0_3, %c0_4] : memref<1x256xf32, #tpu.memory_space<vmem>>, vector<1x256xf32>
    %5 = vector.broadcast %4 : vector<1x256xf32> to vector<16x256xf32>
    %6 = arith.addf %3, %5 : vector<16x256xf32>
    %cst_5 = arith.constant 0.000000e+00 : f32
    %7 = vector.broadcast %cst_5 : f32 to vector<16x256xf32>
    %8 = arith.maximumf %6, %7 : vector<16x256xf32>
    %9 = arith.truncf %8 : vector<16x256xf32> to vector<16x256xbf16>
    %c0_6 = arith.constant 0 : index
    %c0_7 = arith.constant 0 : index
    %10 = vector.load %arg4[%c0_6, %c0_7] : memref<256x128xbf16, #tpu.memory_space<vmem>>, vector<256x128xbf16>
    %cst_8 = arith.constant dense<0.000000e+00> : vector<16x128xf32>
    %11 = tpu.matmul %9, %10, %cst_8 {dimension_numbers = #tpu.dot_dimension_numbers<[1], [0], [0], [1], [0, 0, 1, 1], [], []>} : vector<16x256xbf16>, vector<256x128xbf16>, vector<16x128xf32> -> vector<16x128xf32>
    %c0_9 = arith.constant 0 : index
    %c0_10 = arith.constant 0 : index
    %12 = vector.load %arg5[%c0_9, %c0_10] : memref<1x128xf32, #tpu.memory_space<vmem>>, vector<1x128xf32>
    %13 = vector.broadcast %12 : vector<1x128xf32> to vector<16x128xf32>
    %14 = arith.addf %11, %13 : vector<16x128xf32>
    %cst_11 = arith.constant 0.000000e+00 : f32
    %15 = vector.broadcast %cst_11 : f32 to vector<16x128xf32>
    %16 = arith.maximumf %14, %15 : vector<16x128xf32>
    %17 = arith.truncf %16 : vector<16x128xf32> to vector<16x128xbf16>
    %c0_12 = arith.constant 0 : index
    %c0_13 = arith.constant 0 : index
    %18 = vector.load %arg6[%c0_12, %c0_13] : memref<128x128xbf16, #tpu.memory_space<vmem>>, vector<128x128xbf16>
    %cst_14 = arith.constant dense<0.000000e+00> : vector<16x128xf32>
    %19 = tpu.matmul %17, %18, %cst_14 {dimension_numbers = #tpu.dot_dimension_numbers<[1], [0], [0], [1], [0, 0, 1, 1], [], []>} : vector<16x128xbf16>, vector<128x128xbf16>, vector<16x128xf32> -> vector<16x128xf32>
    %c0_15 = arith.constant 0 : index
    %c0_16 = arith.constant 0 : index
    %20 = vector.load %arg7[%c0_15, %c0_16] : memref<1x128xf32, #tpu.memory_space<vmem>>, vector<1x128xf32>
    %21 = vector.broadcast %20 : vector<1x128xf32> to vector<16x128xf32>
    %22 = arith.addf %19, %21 : vector<16x128xf32>
    %c0_17 = arith.constant 0 : index
    %c0_18 = arith.constant 0 : index
    %23 = vector.load %arg8[%c0_17, %c0_18] : memref<16x128xf32, #tpu.memory_space<vmem>>, vector<16x128xf32>
    tpu.vector_store %arg8[%c0_17, %c0_18], %22 {strides = array<i32>} : memref<16x128xf32, #tpu.memory_space<vmem>>, vector<16x128xf32>,
    return
  }
  func.func @transform_0(%arg0: i32) -> (i32, i32) {
    %c0_i32 = arith.constant 0 : i32
    %c0_i32_0 = arith.constant 0 : i32
    return %arg0, %c0_i32 : i32, i32
  }
  func.func @transform_1(%arg0: i32) -> (i32, i32) {
    %c0_i32 = arith.constant 0 : i32
    %c0_i32_0 = arith.constant 0 : i32
    %c0_i32_1 = arith.constant 0 : i32
    return %c0_i32, %c0_i32_0 : i32, i32
  }
  func.func @transform_2(%arg0: i32) -> (i32, i32) {
    %c0_i32 = arith.constant 0 : i32
    %c0_i32_0 = arith.constant 0 : i32
    %c0_i32_1 = arith.constant 0 : i32
    return %c0_i32, %c0_i32_0 : i32, i32
  }
  func.func @transform_3(%arg0: i32) -> (i32, i32) {
    %c0_i32 = arith.constant 0 : i32
    %c0_i32_0 = arith.constant 0 : i32
    %c0_i32_1 = arith.constant 0 : i32
    return %c0_i32, %c0_i32_0 : i32, i32
  }
  func.func @transform_4(%arg0: i32) -> (i32, i32) {
    %c0_i32 = arith.constant 0 : i32
    %c0_i32_0 = arith.constant 0 : i32
    %c0_i32_1 = arith.constant 0 : i32
    return %c0_i32, %c0_i32_0 : i32, i32
  }
  func.func @transform_5(%arg0: i32) -> (i32, i32) {
    %c0_i32 = arith.constant 0 : i32
    %c0_i32_0 = arith.constant 0 : i32
    %c0_i32_1 = arith.constant 0 : i32
    return %c0_i32, %c0_i32_0 : i32, i32
  }
  func.func @transform_6(%arg0: i32) -> (i32, i32) {
    %c0_i32 = arith.constant 0 : i32
    %c0_i32_0 = arith.constant 0 : i32
    %c0_i32_1 = arith.constant 0 : i32
    return %c0_i32, %c0_i32_0 : i32, i32
  }
  func.func @transform_7(%arg0: i32) -> (i32, i32) {
    %c0_i32 = arith.constant 0 : i32
    %c0_i32_0 = arith.constant 0 : i32
    return %arg0, %c0_i32 : i32, i32
  }
}

</mosaic_0001>

<bundles_post_ra>
// kernel: tpu_custom_call.1
= control target key start
LH: loop header
LB: loop body
LE: loop exit
PB: predicated region body
PF: predicated region fallthrough
CT: control target
= control target key end

     0   :  { %12 = vsyncpa [#allocation3], 0  ;;  %s4816_s0 = inlined_call_operand.hbm [shape: f32[16,3072], index: 0, kind: input, shape index: {}]   ;;  %s4817_s1 = inlined_call_operand.hbm [shape: bf16[3072,256], index: 1, kind: input, shape index: {}]   ;;  %s4818_s2 = inlined_call_operand.hbm [shape: f32[1,256], index: 2, kind: input, shape index: {}]   ;;  %s4819_s3 = inlined_call_operand.hbm [shape: bf16[256,128], index: 3, kind: input, shape index: {}]   ;;  %s4820_s4 = inlined_call_operand.hbm [shape: f32[1,128], index: 4, kind: input, shape index: {}]   ;;  %s4821_s5 = inlined_call_operand.hbm [shape: bf16[128,128], index: 5, kind: input, shape index: {}]   ;;  %s4822_s6 = inlined_call_operand.hbm [shape: f32[1,128], index: 6, kind: input, shape index: {}]   ;;  %s4823_s7 = inlined_call_operand.hbm [shape: f32[16,128], index: 7, kind: output, shape index: {}]  }
   0x1   :  { %13 = vsyncpa [#allocation6], 0 }
   0x2   :  { %14 = vsyncpa [#allocation9], 0 }
   0x3   :  { %15 = vsyncpa [#allocation12], 0 }
   0x4   :  { %16 = vsyncpa [#allocation4], 0  ;;  %s4651_s24 = smov [#allocation5]   ;;  %s4465_s28 = scalar_lea.hbm %s4817_s1, 49152 }
   0x5   :  { %s34_s25 = sshll.u32 %s4651_s24, 4  ;;  %p4466_p0 = scmp.ne.s32.totalorder %s4817_s1, %s4465_s28  ;;  %s35_s25 = int_to_ptr.vmem [resolvable:$true] %s34_s25 }
   0x6   :  { %p4469_p1 = scmp.lt.u32.totalorder %s4465_s28, %s4817_s1 }
   0x8   :  { %p4471_p2 = pnand %p4469_p1, %p4466_p0 }
   0xa   :  { %4474 = shalt.err (!%p4471_p2)
}
   0xb   :  { %s4475_s10 = scalar_lea.vmem %s35_s25, 49152  ;;  %p4480_p4 = scmp.lt.s32.totalorder %s35_s25, %s35_s25 }
   0xc   :  { %p4476_p3 = scmp.ne.s32.totalorder %s35_s25, %s4475_s10  ;;  %p4481_p5 = scmp.lt.s32.totalorder %s4475_s10, %s4475_s10 }
   0xe   :  { %p4482_p6 = por %p4481_p5, %p4480_p4 }
  0x10   :  { %p4483_p7 = pnand %p4482_p6, %p4476_p3 }
  0x12   :  { %4486 = shalt.err (!%p4483_p7)
}
  0x13   :  { %s4652_s11 = smov 128   ;;  %s4653_s12 = smov 8  }
  0x14   :  { %40 = dma.hbm_to_vmem [thread:$0]  %s4817_s1, 49152, %s35_s25, [#allocation6], %s4652_s11, %s4652_s11, %s4653_s12  }
  0x15   :  { %s4654_s15 = smov [#allocation8]   ;;  %s4487_s19 = scalar_lea.hbm %s4819_s3, 2048 }
  0x16   :  { %s56_s16 = sshll.u32 %s4654_s15, 4  ;;  %p4488_p8 = scmp.ne.s32.totalorder %s4819_s3, %s4487_s19  ;;  %s57_s16 = int_to_ptr.vmem [resolvable:$true] %s56_s16 }
  0x17   :  { %p4491_p9 = scmp.lt.u32.totalorder %s4487_s19, %s4819_s3 }
  0x19   :  { %p4493_p10 = pnand %p4491_p9, %p4488_p8 }
  0x1b   :  { %4496 = shalt.err (!%p4493_p10)
}
  0x1c   :  { %s4497_s24 = scalar_lea.vmem %s57_s16, 2048  ;;  %p4502_p12 = scmp.lt.s32.totalorder %s57_s16, %s57_s16 }
  0x1d   :  { %p4498_p11 = scmp.ne.s32.totalorder %s57_s16, %s4497_s24  ;;  %p4503_p13 = scmp.lt.s32.totalorder %s4497_s24, %s4497_s24 }
  0x1f   :  { %p4504_p0 = por %p4503_p13, %p4502_p12 }
  0x21   :  { %p4505_p1 = pnand %p4504_p0, %p4498_p11 }
  0x23   :  { %4508 = shalt.err (!%p4505_p1)
}
  0x24   :  { %s4655_s1 = smov 64   ;;  %s4656_s25 = smov 4  }
  0x25   :  { %62 = dma.hbm_to_vmem [thread:$0]  %s4819_s3, 2048, %s57_s16, [#allocation9], %s4655_s1, %s4655_s1, %s4656_s25  }
  0x26   :  { %s4657_s28 = smov [#allocation11]   ;;  %s4658_s30 = smov [#allocation2]  }
  0x27   :  { %s78_s29 = sshll.u32 %s4657_s28, 4  ;;  %s22_s8 = sshll.u32 %s4658_s30, 4  ;;  %s79_s29 = int_to_ptr.vmem [resolvable:$true] %s78_s29  ;;  %s4734_s8 = int_to_ptr.vmem [resolvable:$true] %s22_s8 }
  0x28   :  { %s4509_s13 = scalar_lea.hbm %s4821_s5, 1024 }
  0x29   :  { %p4510_p2 = scmp.ne.s32.totalorder %s4821_s5, %s4509_s13  ;;  %p4513_p3 = scmp.lt.u32.totalorder %s4509_s13, %s4821_s5 }
  0x2b   :  { %p4515_p4 = pnand %p4513_p3, %p4510_p2 }
  0x2d   :  { %4518 = shalt.err (!%p4515_p4)
}
  0x2e   :  { %s4519_s3 = scalar_lea.vmem %s79_s29, 1024  ;;  %p4524_p6 = scmp.lt.s32.totalorder %s79_s29, %s79_s29 }
  0x2f   :  { %p4520_p5 = scmp.ne.s32.totalorder %s79_s29, %s4519_s3  ;;  %p4525_p7 = scmp.lt.s32.totalorder %s4519_s3, %s4519_s3 }
  0x31   :  { %p4526_p8 = por %p4525_p7, %p4524_p6 }
  0x33   :  { %p4527_p9 = pnand %p4526_p8, %p4520_p5 }
  0x35   :  { %4530 = shalt.err (!%p4527_p9)
}
  0x36   :  { %84 = dma.hbm_to_vmem [thread:$0]  %s4821_s5, 1024, %s79_s29, [#allocation12], %s4655_s1, %s4655_s1, %s4656_s25  }
  0x37   :  { %s4531_s22 = scalar_lea.hbm %s4816_s0, 6144 }
  0x38   :  { %p4532_p10 = scmp.ne.s32.totalorder %s4816_s0, %s4531_s22  ;;  %p4535_p11 = scmp.lt.u32.totalorder %s4531_s22, %s4816_s0 }
  0x3a   :  { %p4537_p12 = pnand %p4535_p11, %p4532_p10 }
  0x3c   :  { %4540 = shalt.err (!%p4537_p12)
}
  0x3d   :  { %s4541_s28 = scalar_lea.vmem %s4734_s8, 6144  ;;  %p4546_p0 = scmp.lt.s32.totalorder %s4734_s8, %s4734_s8 }
  0x3e   :  { %p4542_p13 = scmp.ne.s32.totalorder %s4734_s8, %s4541_s28  ;;  %p4547_p1 = scmp.lt.s32.totalorder %s4541_s28, %s4541_s28 }
  0x40   :  { %p4548_p2 = por %p4547_p1, %p4546_p0 }
  0x42   :  { %p4549_p3 = pnand %p4548_p2, %p4542_p13 }
  0x44   :  { %4552 = shalt.err (!%p4549_p3)
}
  0x45   :  { %s4659_s5 = smov 3072   ;;  %s4660_s1 = smov 192  }
  0x46   :  { %28 = dma.hbm_to_vmem [thread:$0]  %s4816_s0, 6144, %s4734_s8, [#allocation3], %s4659_s5, %s4659_s5, %s4660_s1  }
  0x47   :  { %s4661_s30 = smov [#allocation7]   ;;  %s4662_s10 = smov [#allocation10]  }
  0x48   :  { %s47_s9 = sshll.u32 %s4661_s30, 4  ;;  %s69_s13 = sshll.u32 %s4662_s10, 4  ;;  %s48_s9 = int_to_ptr.vmem [resolvable:$true] %s47_s9  ;;  %s70_s13 = int_to_ptr.vmem [resolvable:$true] %s69_s13 }
  0x49   :  { %s4553_s17 = scalar_lea.hbm %s4818_s2, 32 }
  0x4a   :  { %p4554_p4 = scmp.ne.s32.totalorder %s4818_s2, %s4553_s17  ;;  %p4557_p5 = scmp.lt.u32.totalorder %s4553_s17, %s4818_s2 }
  0x4c   :  { %p4559_p6 = pnand %p4557_p5, %p4554_p4 }
  0x4e   :  { %4562 = shalt.err (!%p4559_p6)
}
  0x4f   :  { %s4563_s0 = scalar_lea.vmem %s48_s9, 32  ;;  %p4568_p8 = scmp.lt.s32.totalorder %s48_s9, %s48_s9 }
  0x50   :  { %p4564_p7 = scmp.ne.s32.totalorder %s48_s9, %s4563_s0  ;;  %p4569_p9 = scmp.lt.s32.totalorder %s4563_s0, %s4563_s0 }
  0x52   :  { %p4570_p10 = por %p4569_p9, %p4568_p8 }
  0x54   :  { %p4571_p11 = pnand %p4570_p10, %p4564_p7 }
  0x56   :  { %4574 = shalt.err (!%p4571_p11)
}
  0x57   :  { %50 = dma.hbm_to_vmem [thread:$0]  %s4818_s2, 32, %s48_s9, [#allocation6]  }
  0x58   :  { %s4575_s23 = scalar_lea.hbm %s4820_s4, 16 }
  0x59   :  { %p4576_p12 = scmp.ne.s32.totalorder %s4820_s4, %s4575_s23  ;;  %p4579_p13 = scmp.lt.u32.totalorder %s4575_s23, %s4820_s4 }
  0x5b   :  { %p4581_p0 = pnand %p4579_p13, %p4576_p12 }
  0x5d   :  { %4584 = shalt.err (!%p4581_p0)
}
  0x5e   :  { %s4585_s5 = scalar_lea.vmem %s70_s13, 16  ;;  %s4589_s1 = scalar_lea.vmem %s70_s13, 32 }
  0x5f   :  { %p4586_p1 = scmp.ne.s32.totalorder %s70_s13, %s4585_s5  ;;  %p4590_p2 = scmp.lt.s32.totalorder %s70_s13, %s70_s13 }
  0x60   :  { %p4591_p3 = scmp.lt.s32.totalorder %s4589_s1, %s4585_s5 }
  0x62   :  { %p4592_p4 = por %p4591_p3, %p4590_p2 }
  0x64   :  { %p4593_p5 = pnand %p4592_p4, %p4586_p1 }
  0x66   :  { %4596 = shalt.err (!%p4593_p5)
}
  0x67   :  { %72 = dma.hbm_to_vmem [thread:$0]  %s4820_s4, 16, %s70_s13, [#allocation9]  }
  0x68   :  { %s4663_s29 = smov [#allocation13]   ;;  %s4597_s14 = scalar_lea.hbm %s4822_s6, 16 }
  0x69   :  { %s91_s30 = sshll.u32 %s4663_s29, 4  ;;  %p4598_p6 = scmp.ne.s32.totalorder %s4822_s6, %s4597_s14  ;;  %s92_s30 = int_to_ptr.vmem [resolvable:$true] %s91_s30 }
  0x6a   :  { %p4601_p7 = scmp.lt.u32.totalorder %s4597_s14, %s4822_s6 }
  0x6c   :  { %p4603_p8 = pnand %p4601_p7, %p4598_p6 }
  0x6e   :  { %4606 = shalt.err (!%p4603_p8)
}
  0x6f   :  { %s4607_s16 = scalar_lea.vmem %s92_s30, 16  ;;  %s4611_s4 = scalar_lea.vmem %s92_s30, 32 }
  0x70   :  { %p4608_p9 = scmp.ne.s32.totalorder %s92_s30, %s4607_s16  ;;  %p4612_p10 = scmp.lt.s32.totalorder %s92_s30, %s92_s30 }
  0x71   :  { %p4613_p11 = scmp.lt.s32.totalorder %s4611_s4, %s4607_s16 }
  0x73   :  { %p4614_p12 = por %p4613_p11, %p4612_p10 }
  0x75   :  { %p4615_p13 = pnand %p4614_p12, %p4608_p9 }
  0x77   :  { %4618 = shalt.err (!%p4615_p13)
}
  0x78   :  { %94 = dma.hbm_to_vmem [thread:$0]  %s4822_s6, 16, %s92_s30, [#allocation12]  }
  0x79   :  { %4641 = dma.done.wait [#allocation3], 6144  }
  0x7a   :  { %4642 = vsyncadd [#allocation3], 4294961152 }
  0x7b   :  { %4643 = dma.done.wait [#allocation6], 49184  }
  0x7c   :  { %4644 = vsyncadd [#allocation6], 4294918112 }
  0x7d   :  { %4645 = dma.done.wait [#allocation9], 2064  }
  0x7e   :  { %4646 = vsyncadd [#allocation9], 4294965232 }
  0x7f   :  { %4647 = dma.done.wait [#allocation12], 1040  }
  0x80   :  { %4648 = vsyncadd [#allocation12], 4294966256  ;;  %v3865_v0 = vld [vmem:[#allocation5 + $0x4] ss:$8 sps:$4 sm:$0xff]   ;;  %v3869_v2 = vld [vmem:[#allocation5] ss:$8 sps:$4 sm:$0xff]  }
  0x81   :  { %v3867_v1 = vld [vmem:[#allocation5 + $0x504] ss:$8 sps:$4 sm:$0xff]   ;;  %2505 = vmatprep.subr.bf16.mxu1 %v3865_v0  ;;  %v3870_v3 = vld [vmem:[#allocation5 + $0x500] ss:$8 sps:$4 sm:$0xff]   ;;  %v3871_v4 = vld [vmem:[#allocation5 + $0x14] ss:$8 sps:$4 sm:$0xff]  }
  0x82   :  { %2720 = vmatprep.subr.bf16.mxu0 %v3867_v1  ;;  %2506 = vmatpush1.bf16.msra.mxu1 %v3869_v2  ;;  %v3873_v5 = vld [vmem:[#allocation5 + $0x514] ss:$8 sps:$4 sm:$0xff]   ;;  %v3875_v6 = vld [vmem:[#allocation5 + $0x10] ss:$8 sps:$4 sm:$0xff]   ;;  %v3877_v8 = vld [vmem:[#allocation5 + $0x24] ss:$8 sps:$4 sm:$0xff]  }
  0x83   :  { %2721 = vmatpush1.bf16.msra.mxu0 %v3870_v3  ;;  %2507 = vmatprep.subr.bf16.mxu1 %v3871_v4  ;;  %v3876_v7 = vld [vmem:[#allocation5 + $0x510] ss:$8 sps:$4 sm:$0xff]   ;;  %v3879_v9 = vld [vmem:[#allocation5 + $0x524] ss:$8 sps:$4 sm:$0xff]   ;;  %v3881_v10 = vld [vmem:[#allocation5 + $0x20] ss:$8 sps:$4 sm:$0xff]  }
  0x84   :  { %2722 = vmatprep.subr.bf16.mxu0 %v3873_v5  ;;  %v3882_v11 = vld [vmem:[#allocation5 + $0x520] ss:$8 sps:$4 sm:$0xff]   ;;  %v3883_v12 = vld [vmem:[#allocation5 + $0x34] ss:$8 sps:$4 sm:$0xff]   ;;  %v3887_v14 = vld [vmem:[#allocation5 + $0x30] ss:$8 sps:$4 sm:$0xff]  }
  0x85   :  { %v3885_v13 = vld [vmem:[#allocation5 + $0x534] ss:$8 sps:$4 sm:$0xff]   ;;  %v3888_v15 = vld [vmem:[#allocation5 + $0x530] ss:$8 sps:$4 sm:$0xff]   ;;  %v3889_v16 = vld [vmem:[#allocation5 + $0x44] ss:$8 sps:$4 sm:$0xff]  }
  0x86   :  { %2508 = vmatpush1.bf16.msra.mxu1 %v3875_v6  ;;  %v3891_v17 = vld [vmem:[#allocation5 + $0x544] ss:$8 sps:$4 sm:$0xff]   ;;  %v3893_v18 = vld [vmem:[#allocation5 + $0x40] ss:$8 sps:$4 sm:$0xff]   ;;  %v3895_v20 = vld [vmem:[#allocation5 + $0x54] ss:$8 sps:$4 sm:$0xff]  }
  0x87   :  { %2723 = vmatpush1.bf16.msra.mxu0 %v3876_v7  ;;  %2509 = vmatprep.subr.bf16.mxu1 %v3877_v8  ;;  %v3894_v19 = vld [vmem:[#allocation5 + $0x540] ss:$8 sps:$4 sm:$0xff]   ;;  %v3897_v21 = vld [vmem:[#allocation5 + $0x554] ss:$8 sps:$4 sm:$0xff]   ;;  %v3899_v22 = vld [vmem:[#allocation5 + $0x50] ss:$8 sps:$4 sm:$0xff]  }
  0x88   :  { %2724 = vmatprep.subr.bf16.mxu0 %v3879_v9  ;;  %v3900_v23 = vld [vmem:[#allocation5 + $0x550] ss:$8 sps:$4 sm:$0xff]   ;;  %v3901_v24 = vld [vmem:[#allocation5 + $0x64] ss:$8 sps:$4 sm:$0xff]   ;;  %v3905_v26 = vld [vmem:[#allocation5 + $0x60] ss:$8 sps:$4 sm:$0xff]  }
  0x89   :  { %v3903_v25 = vld [vmem:[#allocation5 + $0x564] ss:$8 sps:$4 sm:$0xff]   ;;  %v3906_v27 = vld [vmem:[#allocation5 + $0x560] ss:$8 sps:$4 sm:$0xff]   ;;  %v3907_v28 = vld [vmem:[#allocation5 + $0x74] ss:$8 sps:$4 sm:$0xff]  }
  0x8a   :  { %2510 = vmatpush1.bf16.msra.mxu1 %v3881_v10  ;;  %v3909_v29 = vld [vmem:[#allocation5 + $0x574] ss:$8 sps:$4 sm:$0xff]   ;;  %v3911_v30 = vld [vmem:[#allocation5 + $0x70] ss:$8 sps:$4 sm:$0xff]   ;;  %v3913_v32 = vld [vmem:[#allocation5 + $0x84] ss:$8 sps:$4 sm:$0xff]  }
  0x8b   :  { %2725 = vmatpush1.bf16.msra.mxu0 %v3882_v11  ;;  %2511 = vmatprep.subr.bf16.mxu1 %v3883_v12  ;;  %v3912_v31 = vld [vmem:[#allocation5 + $0x570] ss:$8 sps:$4 sm:$0xff]   ;;  %v3915_v33 = vld [vmem:[#allocation5 + $0x584] ss:$8 sps:$4 sm:$0xff]   ;;  %v3917_v34 = vld [vmem:[#allocation5 + $0x80] ss:$8 sps:$4 sm:$0xff]  }
  0x8c   :  { %2726 = vmatprep.subr.bf16.mxu0 %v3885_v13  ;;  %v3918_v35 = vld [vmem:[#allocation5 + $0x580] ss:$8 sps:$4 sm:$0xff]   ;;  %v3919_v36 = vld [vmem:[#allocation5 + $0x94] ss:$8 sps:$4 sm:$0xff]   ;;  %v3923_v38 = vld [vmem:[#allocation5 + $0x90] ss:$8 sps:$4 sm:$0xff]  }
  0x8d   :  { %v3921_v37 = vld [vmem:[#allocation5 + $0x594] ss:$8 sps:$4 sm:$0xff]   ;;  %v3924_v39 = vld [vmem:[#allocation5 + $0x590] ss:$8 sps:$4 sm:$0xff]   ;;  %v3925_v40 = vld [vmem:[#allocation5 + $0xa4] ss:$8 sps:$4 sm:$0xff]  }
  0x8e   :  { %2512 = vmatpush1.bf16.msra.mxu1 %v3887_v14  ;;  %v3927_v41 = vld [vmem:[#allocation5 + $0x5a4] ss:$8 sps:$4 sm:$0xff]   ;;  %v3929_v42 = vld [vmem:[#allocation5 + $0xa0] ss:$8 sps:$4 sm:$0xff]   ;;  %v3931_v44 = vld [vmem:[#allocation5 + $0xb4] ss:$8 sps:$4 sm:$0xff]  }
  0x8f   :  { %2727 = vmatpush1.bf16.msra.mxu0 %v3888_v15  ;;  %2513 = vmatprep.subr.bf16.mxu1 %v3889_v16  ;;  %v3930_v43 = vld [vmem:[#allocation5 + $0x5a0] ss:$8 sps:$4 sm:$0xff]   ;;  %v3933_v45 = vld [vmem:[#allocation5 + $0x5b4] ss:$8 sps:$4 sm:$0xff]   ;;  %v3935_v46 = vld [vmem:[#allocation5 + $0xb0] ss:$8 sps:$4 sm:$0xff]  }
  0x90   :  { %2728 = vmatprep.subr.bf16.mxu0 %v3891_v17  ;;  %v3936_v47 = vld [vmem:[#allocation5 + $0x5b0] ss:$8 sps:$4 sm:$0xff]   ;;  %v118_v48 = vld [vmem:[#allocation2 + $0x8] sm:$0xff]  ;;  %v3943_v58 = vld [vmem:[#allocation5 + $0xd4] ss:$8 sps:$4 sm:$0xff]   ;;  %vm4665_vm0 = vmmov 0  }
  0x91   :  { %v142_v49 = vld [vmem:[#allocation2 + $0xc8] sm:$0xff]  ;;  %v128_v53 = vld [vmem:[#allocation2 + $0x58] sm:$0xff]  ;;  %v117_v6 = vld [vmem:[#allocation2] sm:$0xff]  ;;  %s4666_s6 = smov [#allocation14]  }
  0x92   :  { %2514 = vmatpush1.bf16.msra.mxu1 %v3893_v18  ;;  %v3937_v50 = vld [vmem:[#allocation5 + $0xc4] ss:$8 sps:$4 sm:$0xff]   ;;  %v166_v52 = vpack.c.bf16 %v142_v49, %v118_v48  ;;  %v152_v54 = vld [vmem:[#allocation2 + $0x118] sm:$0xff]  ;;  %v3941_v56 = vld [vmem:[#allocation5 + $0xc0] ss:$8 sps:$4 sm:$0xff]   ;;  %s3325_s0 = sshll.u32 %s4666_s6, 4  ;;  %s3326_s0 = int_to_ptr.vmem [resolvable:$true] %s3325_s0 }
  0x93   :  { %2729 = vmatpush1.bf16.msra.mxu0 %v3894_v19  ;;  %2515 = vmatprep.subr.bf16.mxu1 %v3895_v20  ;;  %v3939_v51 = vld [vmem:[#allocation5 + $0x5c4] ss:$8 sps:$4 sm:$0xff]   ;;  %v176_v55 = vpack.c.bf16 %v152_v54, %v128_v53  ;;  %v3942_v57 = vld [vmem:[#allocation5 + $0x5c0] ss:$8 sps:$4 sm:$0xff]   ;;  %v3945_v59 = vld [vmem:[#allocation5 + $0x5d4] ss:$8 sps:$4 sm:$0xff]   ;;  %p4624_p1 = scmp.lt.s32.totalorder %s3326_s0, %s3326_s0 }
  0x94   :  { %2730 = vmatprep.subr.bf16.mxu0 %v3897_v21  ;;  %2537 = vmatprep.mubr.bf16.mxu1 %v166_v52  ;;  %v3947_v60 = vld [vmem:[#allocation5 + $0xd0] ss:$8 sps:$4 sm:$0xff]   ;;  %v3949_v62 = vld [vmem:[#allocation5 + $0xe4] ss:$8 sps:$4 sm:$0xff]   ;;  %v3953_v0 = vld [vmem:[#allocation5 + $0xe0] ss:$8 sps:$4 sm:$0xff]  }
  0x95   :  { %2752 = vmatprep.mubr.bf16.mxu0 %v176_v55  ;;  %v3948_v61 = vld [vmem:[#allocation5 + $0x5d0] ss:$8 sps:$4 sm:$0xff]   ;;  %v3951_v63 = vld [vmem:[#allocation5 + $0x5e4] ss:$8 sps:$4 sm:$0xff]   ;;  %v3954_v1 = vld [vmem:[#allocation5 + $0x5e0] ss:$8 sps:$4 sm:$0xff]  }
  0x96   :  { %2516 = vmatpush1.bf16.msra.mxu1 %v3899_v22  ;;  %v3955_v2 = vld [vmem:[#allocation5 + $0xf4] ss:$8 sps:$4 sm:$0xff]   ;;  %v3959_v4 = vld [vmem:[#allocation5 + $0xf0] ss:$8 sps:$4 sm:$0xff]   ;;  %v3963_v7 = vld [vmem:[#allocation5 + $0x104] ss:$8 sps:$4 sm:$0xff]  }
  0x97   :  { %2731 = vmatpush1.bf16.msra.mxu0 %v3900_v23  ;;  %2517 = vmatprep.subr.bf16.mxu1 %v3901_v24  ;;  %v3957_v3 = vld [vmem:[#allocation5 + $0x5f4] ss:$8 sps:$4 sm:$0xff]   ;;  %v3960_v5 = vld [vmem:[#allocation5 + $0x5f0] ss:$8 sps:$4 sm:$0xff]   ;;  %v141_v8 = vld [vmem:[#allocation2 + $0xc0] sm:$0xff]  ;;  %s4619_s8 = scalar_lea.vmem %s3326_s0, 256 }
  0x98   :  { %2732 = vmatprep.subr.bf16.mxu0 %v3903_v25  ;;  %v127_v9 = vld [vmem:[#allocation2 + $0x50] sm:$0xff]  ;;  %v3966_v11 = vld [vmem:[#allocation5 + $0x604] ss:$8 sps:$4 sm:$0xff]   ;;  %v3961_v12 = vld [vmem:[#allocation5 + $0x100] ss:$8 sps:$4 sm:$0xff]   ;;  %v165_v14 = vpack.c.bf16 %v141_v8, %v117_v6  ;;  %p4620_p0 = scmp.ne.s32.totalorder %s3326_s0, %s4619_s8  ;;  %p4625_p2 = scmp.lt.s32.totalorder %s4619_s8, %s4619_s8 }
  0x99   :  { %v151_v10 = vld [vmem:[#allocation2 + $0x110] sm:$0xff]  ;;  %v3964_v13 = vld [vmem:[#allocation5 + $0x600] ss:$8 sps:$4 sm:$0xff]   ;;  %v3975_v20 = vld [vmem:[#allocation5 + $0x124] ss:$8 sps:$4 sm:$0xff]  }
  0x9a   :  { %2518 = vmatpush1.bf16.msra.mxu1 %v3905_v26  ;;  %v175_v15 = vpack.c.bf16 %v151_v10, %v127_v9  ;;  %v3969_v16 = vld [vmem:[#allocation5 + $0x114] ss:$8 sps:$4 sm:$0xff]   ;;  %v3967_v18 = vld [vmem:[#allocation5 + $0x110] ss:$8 sps:$4 sm:$0xff]   ;;  %v3978_v21 = vld [vmem:[#allocation5 + $0x624] ss:$8 sps:$4 sm:$0xff]   ;;  %p4626_p3 = por %p4625_p2, %p4624_p1 }
  0x9b   :  { %2733 = vmatpush1.bf16.msra.mxu0 %v3906_v27  ;;  %2519 = vmatprep.subr.bf16.mxu1 %v3907_v28  ;;  %v3972_v17 = vld [vmem:[#allocation5 + $0x614] ss:$8 sps:$4 sm:$0xff]   ;;  %v3970_v19 = vld [vmem:[#allocation5 + $0x610] ss:$8 sps:$4 sm:$0xff]   ;;  %v3973_v22 = vld [vmem:[#allocation5 + $0x120] ss:$8 sps:$4 sm:$0xff]  }
  0x9c   :  { %2734 = vmatprep.subr.bf16.mxu0 %v3909_v29  ;;  %v3976_v23 = vld [vmem:[#allocation5 + $0x620] ss:$8 sps:$4 sm:$0xff]   ;;  %v3981_v24 = vld [vmem:[#allocation5 + $0x134] ss:$8 sps:$4 sm:$0xff]   ;;  %v3979_v26 = vld [vmem:[#allocation5 + $0x130] ss:$8 sps:$4 sm:$0xff]   ;;  %p4627_p4 = pnand %p4626_p3, %p4620_p0 }
  0x9d   :  { %v3984_v25 = vld [vmem:[#allocation5 + $0x634] ss:$8 sps:$4 sm:$0xff]   ;;  %v3982_v27 = vld [vmem:[#allocation5 + $0x630] ss:$8 sps:$4 sm:$0xff]   ;;  %v3987_v28 = vld [vmem:[#allocation5 + $0x144] ss:$8 sps:$4 sm:$0xff]  }
  0x9e   :  { %2520 = vmatpush1.bf16.msra.mxu1 %v3911_v30  ;;  %v3990_v29 = vld [vmem:[#allocation5 + $0x644] ss:$8 sps:$4 sm:$0xff]   ;;  %v3985_v30 = vld [vmem:[#allocation5 + $0x140] ss:$8 sps:$4 sm:$0xff]   ;;  %v4003_v48 = vld [vmem:[#allocation5 + $0x170] ss:$8 sps:$4 sm:$0xff]  }
  0x9f   :  { %2735 = vmatpush1.bf16.msra.mxu0 %v3912_v31  ;;  %2521 = vmatprep.subr.bf16.mxu1 %v3913_v32  ;;  %v3988_v31 = vld [vmem:[#allocation5 + $0x640] ss:$8 sps:$4 sm:$0xff]   ;;  %v3993_v32 = vld [vmem:[#allocation5 + $0x154] ss:$8 sps:$4 sm:$0xff]   ;;  %v4006_v49 = vld [vmem:[#allocation5 + $0x670] ss:$8 sps:$4 sm:$0xff]  }
  0xa0   :  { %2736 = vmatprep.subr.bf16.mxu0 %v3915_v33  ;;  %v3996_v33 = vld [vmem:[#allocation5 + $0x654] ss:$8 sps:$4 sm:$0xff]   ;;  %v4009_v52 = vld [vmem:[#allocation5 + $0x180] ss:$8 sps:$4 sm:$0xff]   ;;  %v4039_v8 = vld [vmem:[#allocation5 + $0x1d0] ss:$8 sps:$4 sm:$0xff]  }
  0xa1   :  { %v4012_v53 = vld [vmem:[#allocation5 + $0x680] ss:$8 sps:$4 sm:$0xff]   ;;  %v4017_v54 = vld [vmem:[#allocation5 + $0x194] ss:$8 sps:$4 sm:$0xff]   ;;  %v4042_v9 = vld [vmem:[#allocation5 + $0x6d0] ss:$8 sps:$4 sm:$0xff]  }
  0xa2   :  { %2522 = vmatpush1.bf16.msra.mxu1 %v3917_v34  ;;  %v3991_v34 = vld [vmem:[#allocation5 + $0x150] ss:$8 sps:$4 sm:$0xff]   ;;  %v4020_v55 = vld [vmem:[#allocation5 + $0x694] ss:$8 sps:$4 sm:$0xff]   ;;  %v4047_v10 = vld [vmem:[#allocation5 + $0x1e4] ss:$8 sps:$4 sm:$0xff]  }
  0xa3   :  { %2737 = vmatpush1.bf16.msra.mxu0 %v3918_v35  ;;  %2523 = vmatprep.subr.bf16.mxu1 %v3919_v36  ;;  %v3994_v35 = vld [vmem:[#allocation5 + $0x650] ss:$8 sps:$4 sm:$0xff]   ;;  %v3999_v36 = vld [vmem:[#allocation5 + $0x164] ss:$8 sps:$4 sm:$0xff]   ;;  %v4041_v6 = vld [vmem:[#allocation5 + $0x1d4] ss:$8 sps:$4 sm:$0xff]  }
  0xa4   :  { %2738 = vmatprep.subr.bf16.mxu0 %v3921_v37  ;;  %v4002_v37 = vld [vmem:[#allocation5 + $0x664] ss:$8 sps:$4 sm:$0xff]  }
  0xa6   :  { %2524 = vmatpush1.bf16.msra.mxu1 %v3923_v38  ;;  %v3997_v38 = vld [vmem:[#allocation5 + $0x160] ss:$8 sps:$4 sm:$0xff]  }
  0xa7   :  { %2739 = vmatpush1.bf16.msra.mxu0 %v3924_v39  ;;  %2525 = vmatprep.subr.bf16.mxu1 %v3925_v40  ;;  %v4000_v39 = vld [vmem:[#allocation5 + $0x660] ss:$8 sps:$4 sm:$0xff]   ;;  %v120_v40 = vld [vmem:[#allocation2 + $0x18] sm:$0xff] }
  0xa8   :  { %2740 = vmatprep.subr.bf16.mxu0 %v3927_v41  ;;  %v144_v41 = vld [vmem:[#allocation2 + $0xd8] sm:$0xff] }
  0xaa   :  { %2526 = vmatpush1.bf16.msra.mxu1 %v3929_v42  ;;  %v4005_v42 = vld [vmem:[#allocation5 + $0x174] ss:$8 sps:$4 sm:$0xff]  }
  0xab   :  { %2741 = vmatpush1.bf16.msra.mxu0 %v3930_v43  ;;  %2527 = vmatprep.subr.bf16.mxu1 %v3931_v44  ;;  %v4008_v43 = vld [vmem:[#allocation5 + $0x674] ss:$8 sps:$4 sm:$0xff]   ;;  %v168_v44 = vpack.c.bf16 %v144_v41, %v120_v40  ;;  %v4072_v40 = vld [vmem:[#allocation5 + $0x720] ss:$8 sps:$4 sm:$0xff]  }
  0xac   :  { %2742 = vmatprep.subr.bf16.mxu0 %v3933_v45  ;;  %v130_v45 = vld [vmem:[#allocation2 + $0x68] sm:$0xff] }
  0xae   :  { %2528 = vmatpush1.bf16.msra.mxu1 %v3935_v46  ;;  %v154_v46 = vld [vmem:[#allocation2 + $0x128] sm:$0xff] }
  0xaf   :  { %2743 = vmatpush1.bf16.msra.mxu0 %v3936_v47  ;;  %2529 = vmatprep.subr.bf16.mxu1 %v3937_v50  ;;  %v178_v47 = vpack.c.bf16 %v154_v46, %v130_v45  ;;  %v4011_v50 = vld [vmem:[#allocation5 + $0x184] ss:$8 sps:$4 sm:$0xff]   ;;  %v4078_v45 = vld [vmem:[#allocation5 + $0x730] ss:$8 sps:$4 sm:$0xff]  }
  0xb0   :  { %2744 = vmatprep.subr.bf16.mxu0 %v3939_v51  ;;  %v4014_v51 = vld [vmem:[#allocation5 + $0x684] ss:$8 sps:$4 sm:$0xff]  }
  0xb1   :  { %v4083_v46 = vld [vmem:[#allocation5 + $0x244] ss:$8 sps:$4 sm:$0xff]  }
  0xb2   :  { %2530 = vmatpush1.bf16.msra.mxu1 %v3941_v56  ;;  %v4015_v56 = vld [vmem:[#allocation5 + $0x190] ss:$8 sps:$4 sm:$0xff]  }
  0xb3   :  { %2745 = vmatpush1.bf16.msra.mxu0 %v3942_v57  ;;  %2531 = vmatprep.subr.bf16.mxu1 %v3943_v58  ;;  %v4018_v57 = vld [vmem:[#allocation5 + $0x690] ss:$8 sps:$4 sm:$0xff]   ;;  %v4023_v58 = vld [vmem:[#allocation5 + $0x1a4] ss:$8 sps:$4 sm:$0xff]  }
  0xb4   :  { %2746 = vmatprep.subr.bf16.mxu0 %v3945_v59  ;;  %v4026_v59 = vld [vmem:[#allocation5 + $0x6a4] ss:$8 sps:$4 sm:$0xff]  }
  0xb6   :  { %2532 = vmatpush1.bf16.msra.mxu1 %v3947_v60  ;;  %v4021_v60 = vld [vmem:[#allocation5 + $0x1a0] ss:$8 sps:$4 sm:$0xff]  }
  0xb7   :  { %2747 = vmatpush1.bf16.msra.mxu0 %v3948_v61  ;;  %2533 = vmatprep.subr.bf16.mxu1 %v3949_v62  ;;  %v4024_v61 = vld [vmem:[#allocation5 + $0x6a0] ss:$8 sps:$4 sm:$0xff]   ;;  %v4029_v62 = vld [vmem:[#allocation5 + $0x1b4] ss:$8 sps:$4 sm:$0xff]  }
  0xb8   :  { %2748 = vmatprep.subr.bf16.mxu0 %v3951_v63  ;;  %v4032_v63 = vld [vmem:[#allocation5 + $0x6b4] ss:$8 sps:$4 sm:$0xff]  }
  0xba   :  { %2534 = vmatpush1.bf16.msra.mxu1 %v3953_v0  ;;  %v4027_v0 = vld [vmem:[#allocation5 + $0x1b0] ss:$8 sps:$4 sm:$0xff]  }
  0xbb   :  { %2749 = vmatpush1.bf16.msra.mxu0 %v3954_v1  ;;  %2535 = vmatprep.subr.bf16.mxu1 %v3955_v2  ;;  %v4030_v1 = vld [vmem:[#allocation5 + $0x6b0] ss:$8 sps:$4 sm:$0xff]   ;;  %v4035_v2 = vld [vmem:[#allocation5 + $0x1c4] ss:$8 sps:$4 sm:$0xff]  }
  0xbc   :  { %2750 = vmatprep.subr.bf16.mxu0 %v3957_v3  ;;  %v4038_v3 = vld [vmem:[#allocation5 + $0x6c4] ss:$8 sps:$4 sm:$0xff]  }
  0xbe   :  { %2536 = vmatpush1.bf16.msra.mxu1 %v3959_v4  ;;  %v4033_v4 = vld [vmem:[#allocation5 + $0x1c0] ss:$8 sps:$4 sm:$0xff]  }
  0xbf   :  { %2751 = vmatpush1.bf16.msra.mxu0 %v3960_v5  ;;  %2548 = vmatprep.subr.bf16.mxu1 %v3963_v7  ;;  %v4036_v5 = vld [vmem:[#allocation5 + $0x6c0] ss:$8 sps:$4 sm:$0xff]   ;;  %v4044_v7 = vld [vmem:[#allocation5 + $0x6d4] ss:$8 sps:$4 sm:$0xff]  }
  0xc0   :  { %2763 = vmatprep.subr.bf16.mxu0 %v3966_v11  ;;  %v4050_v11 = vld [vmem:[#allocation5 + $0x6e4] ss:$8 sps:$4 sm:$0xff]  }
  0xc1   :  { %2538 = vmatmul.mubr.bf16.vlgmr.msra.gmra.mrb[0].mxu1 %v165_v14  ;;  %v4053_v14 = vld [vmem:[#allocation5 + $0x1f4] ss:$8 sps:$4 sm:$0xff]  }
  0xc2   :  { %2753 = vmatmul.mubr.bf16.vlgmr.msra.gmra.mrb[0].mxu0 %v175_v15  ;;  %2549 = vmatpush1.bf16.msra.mxu1 %v3961_v12  ;;  %v4045_v12 = vld [vmem:[#allocation5 + $0x1e0] ss:$8 sps:$4 sm:$0xff]   ;;  %v4056_v15 = vld [vmem:[#allocation5 + $0x6f4] ss:$8 sps:$4 sm:$0xff]  }
  0xc3   :  { %2764 = vmatpush1.bf16.msra.mxu0 %v3964_v13  ;;  %2550 = vmatprep.subr.bf16.mxu1 %v3969_v16  ;;  %v4048_v13 = vld [vmem:[#allocation5 + $0x6e0] ss:$8 sps:$4 sm:$0xff]   ;;  %v4051_v16 = vld [vmem:[#allocation5 + $0x1f0] ss:$8 sps:$4 sm:$0xff]  }
  0xc4   :  { %2765 = vmatprep.subr.bf16.mxu0 %v3972_v17  ;;  %2580 = vmatprep.mubr.bf16.mxu1 %v168_v44  ;;  %v4054_v17 = vld [vmem:[#allocation5 + $0x6f0] ss:$8 sps:$4 sm:$0xff]  }
  0xc5   :  { %2795 = vmatprep.mubr.bf16.mxu0 %v178_v47  ;;  %v4075_v44 = vld [vmem:[#allocation5 + $0x230] ss:$8 sps:$4 sm:$0xff]   ;;  %v4086_v47 = vld [vmem:[#allocation5 + $0x744] ss:$8 sps:$4 sm:$0xff]  }
  0xc6   :  { %2551 = vmatpush1.bf16.msra.mxu1 %v3967_v18  ;;  %v119_v18 = vld [vmem:[#allocation2 + $0x10] sm:$0xff] }
  0xc7   :  { %2766 = vmatpush1.bf16.msra.mxu0 %v3970_v19  ;;  %2552 = vmatprep.subr.bf16.mxu1 %v3975_v20  ;;  %v4059_v19 = vld [vmem:[#allocation5 + $0x204] ss:$8 sps:$4 sm:$0xff]   ;;  %v143_v20 = vld [vmem:[#allocation2 + $0xd0] sm:$0xff] }
  0xc8   :  { %2767 = vmatprep.subr.bf16.mxu0 %v3978_v21  ;;  %v129_v21 = vld [vmem:[#allocation2 + $0x60] sm:$0xff] }
  0xca   :  { %2553 = vmatpush1.bf16.msra.mxu1 %v3973_v22  ;;  %v153_v22 = vld [vmem:[#allocation2 + $0x120] sm:$0xff] }
  0xcb   :  { %2768 = vmatpush1.bf16.msra.mxu0 %v3976_v23  ;;  %2554 = vmatprep.subr.bf16.mxu1 %v3981_v24  ;;  %v4062_v23 = vld [vmem:[#allocation5 + $0x704] ss:$8 sps:$4 sm:$0xff]   ;;  %v4057_v24 = vld [vmem:[#allocation5 + $0x200] ss:$8 sps:$4 sm:$0xff]  }
  0xcc   :  { %2769 = vmatprep.subr.bf16.mxu0 %v3984_v25  ;;  %v4060_v25 = vld [vmem:[#allocation5 + $0x700] ss:$8 sps:$4 sm:$0xff]  }
  0xce   :  { %2555 = vmatpush1.bf16.msra.mxu1 %v3979_v26  ;;  %v167_v26 = vpack.c.bf16 %v143_v20, %v119_v18  ;;  %v4137_v18 = vld [vmem:[#allocation5 + $0x2d4] ss:$8 sps:$4 sm:$0xff]   ;;  %v4135_v20 = vld [vmem:[#allocation5 + $0x2d0] ss:$8 sps:$4 sm:$0xff]  }
  0xcf   :  { %2770 = vmatpush1.bf16.msra.mxu0 %v3982_v27  ;;  %2556 = vmatprep.subr.bf16.mxu1 %v3987_v28  ;;  %v177_v27 = vpack.c.bf16 %v153_v22, %v129_v21  ;;  %v4065_v28 = vld [vmem:[#allocation5 + $0x214] ss:$8 sps:$4 sm:$0xff]   ;;  %v4138_v21 = vld [vmem:[#allocation5 + $0x7d0] ss:$8 sps:$4 sm:$0xff]   ;;  %v4143_v22 = vld [vmem:[#allocation5 + $0x2e4] ss:$8 sps:$4 sm:$0xff]  }
  0xd0   :  { %2771 = vmatprep.subr.bf16.mxu0 %v3990_v29  ;;  %v4068_v29 = vld [vmem:[#allocation5 + $0x714] ss:$8 sps:$4 sm:$0xff]  }
  0xd2   :  { %2557 = vmatpush1.bf16.msra.mxu1 %v3985_v30  ;;  %v4063_v30 = vld [vmem:[#allocation5 + $0x210] ss:$8 sps:$4 sm:$0xff]  }
  0xd3   :  { %2772 = vmatpush1.bf16.msra.mxu0 %v3988_v31  ;;  %2558 = vmatprep.subr.bf16.mxu1 %v3993_v32  ;;  %v4066_v31 = vld [vmem:[#allocation5 + $0x710] ss:$8 sps:$4 sm:$0xff]   ;;  %v4071_v32 = vld [vmem:[#allocation5 + $0x224] ss:$8 sps:$4 sm:$0xff]  }
  0xd4   :  { %2773 = vmatprep.subr.bf16.mxu0 %v3996_v33  ;;  %v4074_v33 = vld [vmem:[#allocation5 + $0x724] ss:$8 sps:$4 sm:$0xff]  }
  0xd6   :  { %2559 = vmatpush1.bf16.msra.mxu1 %v3991_v34  ;;  %v122_v34 = vld [vmem:[#allocation2 + $0x28] sm:$0xff] }
  0xd7   :  { %2774 = vmatpush1.bf16.msra.mxu0 %v3994_v35  ;;  %2560 = vmatprep.subr.bf16.mxu1 %v3999_v36  ;;  %v146_v35 = vld [vmem:[#allocation2 + $0xe8] sm:$0xff] }
  0xd8   :  { %2775 = vmatprep.subr.bf16.mxu0 %v4002_v37  ;;  %v170_v36 = vpack.c.bf16 %v146_v35, %v122_v34  ;;  %v4069_v37 = vld [vmem:[#allocation5 + $0x220] ss:$8 sps:$4 sm:$0xff]   ;;  %v155_v34 = vld [vmem:[#allocation2 + $0x130] sm:$0xff]  ;;  %v4158_v35 = vld [vmem:[#allocation5 + $0x804] ss:$8 sps:$4 sm:$0xff]  }
  0xda   :  { %2561 = vmatpush1.bf16.msra.mxu1 %v3997_v38  ;;  %v132_v38 = vld [vmem:[#allocation2 + $0x78] sm:$0xff] }
  0xdb   :  { %2776 = vmatpush1.bf16.msra.mxu0 %v4000_v39  ;;  %2562 = vmatprep.subr.bf16.mxu1 %v4005_v42  ;;  %v156_v39 = vld [vmem:[#allocation2 + $0x138] sm:$0xff] }
  0xdc   :  { %2777 = vmatprep.subr.bf16.mxu0 %v4008_v43  ;;  %v180_v41 = vpack.c.bf16 %v156_v39, %v132_v38  ;;  %v4077_v42 = vld [vmem:[#allocation5 + $0x234] ss:$8 sps:$4 sm:$0xff]  }
  0xdd   :  { %v4080_v43 = vld [vmem:[#allocation5 + $0x734] ss:$8 sps:$4 sm:$0xff]  }
  0xde   :  { %2563 = vmatpush1.bf16.msra.mxu1 %v4003_v48  ;;  %v4081_v48 = vld [vmem:[#allocation5 + $0x240] ss:$8 sps:$4 sm:$0xff]   ;;  %v124_v38 = vld [vmem:[#allocation2 + $0x38] sm:$0xff] }
  0xdf   :  { %2778 = vmatpush1.bf16.msra.mxu0 %v4006_v49  ;;  %2564 = vmatprep.subr.bf16.mxu1 %v4011_v50  ;;  %v4084_v49 = vld [vmem:[#allocation5 + $0x740] ss:$8 sps:$4 sm:$0xff]   ;;  %v4089_v50 = vld [vmem:[#allocation5 + $0x254] ss:$8 sps:$4 sm:$0xff]  }
  0xe0   :  { %2779 = vmatprep.subr.bf16.mxu0 %v4014_v51  ;;  %v4092_v51 = vld [vmem:[#allocation5 + $0x754] ss:$8 sps:$4 sm:$0xff]  }
  0xe1   :  { %v148_v39 = vld [vmem:[#allocation2 + $0xf8] sm:$0xff] }
  0xe2   :  { %2565 = vmatpush1.bf16.msra.mxu1 %v4009_v52  ;;  %v4087_v52 = vld [vmem:[#allocation5 + $0x250] ss:$8 sps:$4 sm:$0xff]  }
  0xe3   :  { %2780 = vmatpush1.bf16.msra.mxu0 %v4012_v53  ;;  %2566 = vmatprep.subr.bf16.mxu1 %v4017_v54  ;;  %v4090_v53 = vld [vmem:[#allocation5 + $0x750] ss:$8 sps:$4 sm:$0xff]   ;;  %v4095_v54 = vld [vmem:[#allocation5 + $0x264] ss:$8 sps:$4 sm:$0xff]  }
  0xe4   :  { %2781 = vmatprep.subr.bf16.mxu0 %v4020_v55  ;;  %v4098_v55 = vld [vmem:[#allocation5 + $0x764] ss:$8 sps:$4 sm:$0xff]  }
  0xe6   :  { %2567 = vmatpush1.bf16.msra.mxu1 %v4015_v56  ;;  %v4093_v56 = vld [vmem:[#allocation5 + $0x260] ss:$8 sps:$4 sm:$0xff]  }
  0xe7   :  { %2782 = vmatpush1.bf16.msra.mxu0 %v4018_v57  ;;  %2568 = vmatprep.subr.bf16.mxu1 %v4023_v58  ;;  %v4096_v57 = vld [vmem:[#allocation5 + $0x760] ss:$8 sps:$4 sm:$0xff]   ;;  %v4101_v58 = vld [vmem:[#allocation5 + $0x274] ss:$8 sps:$4 sm:$0xff]  }
  0xe8   :  { %2783 = vmatprep.subr.bf16.mxu0 %v4026_v59  ;;  %v4104_v59 = vld [vmem:[#allocation5 + $0x774] ss:$8 sps:$4 sm:$0xff]  }
  0xea   :  { %2569 = vmatpush1.bf16.msra.mxu1 %v4021_v60  ;;  %v4099_v60 = vld [vmem:[#allocation5 + $0x270] ss:$8 sps:$4 sm:$0xff]  }
  0xeb   :  { %2784 = vmatpush1.bf16.msra.mxu0 %v4024_v61  ;;  %2570 = vmatprep.subr.bf16.mxu1 %v4029_v62  ;;  %v4102_v61 = vld [vmem:[#allocation5 + $0x770] ss:$8 sps:$4 sm:$0xff]   ;;  %v4107_v62 = vld [vmem:[#allocation5 + $0x284] ss:$8 sps:$4 sm:$0xff]  }
  0xec   :  { %2785 = vmatprep.subr.bf16.mxu0 %v4032_v63  ;;  %v4110_v63 = vld [vmem:[#allocation5 + $0x784] ss:$8 sps:$4 sm:$0xff]  }
  0xee   :  { %2571 = vmatpush1.bf16.msra.mxu1 %v4027_v0  ;;  %v4105_v0 = vld [vmem:[#allocation5 + $0x280] ss:$8 sps:$4 sm:$0xff]  }
  0xef   :  { %2786 = vmatpush1.bf16.msra.mxu0 %v4030_v1  ;;  %2572 = vmatprep.subr.bf16.mxu1 %v4035_v2  ;;  %v4108_v1 = vld [vmem:[#allocation5 + $0x780] ss:$8 sps:$4 sm:$0xff]   ;;  %v4113_v2 = vld [vmem:[#allocation5 + $0x294] ss:$8 sps:$4 sm:$0xff]  }
  0xf0   :  { %2787 = vmatprep.subr.bf16.mxu0 %v4038_v3  ;;  %v4116_v3 = vld [vmem:[#allocation5 + $0x794] ss:$8 sps:$4 sm:$0xff]  }
  0xf2   :  { %2573 = vmatpush1.bf16.msra.mxu1 %v4033_v4  ;;  %v4111_v4 = vld [vmem:[#allocation5 + $0x290] ss:$8 sps:$4 sm:$0xff]  }
  0xf3   :  { %2788 = vmatpush1.bf16.msra.mxu0 %v4036_v5  ;;  %2574 = vmatprep.subr.bf16.mxu1 %v4041_v6  ;;  %v4114_v5 = vld [vmem:[#allocation5 + $0x790] ss:$8 sps:$4 sm:$0xff]   ;;  %v4119_v6 = vld [vmem:[#allocation5 + $0x2a4] ss:$8 sps:$4 sm:$0xff]  }
  0xf4   :  { %2789 = vmatprep.subr.bf16.mxu0 %v4044_v7  ;;  %v4122_v7 = vld [vmem:[#allocation5 + $0x7a4] ss:$8 sps:$4 sm:$0xff]  }
  0xf6   :  { %2575 = vmatpush1.bf16.msra.mxu1 %v4039_v8  ;;  %v4117_v8 = vld [vmem:[#allocation5 + $0x2a0] ss:$8 sps:$4 sm:$0xff]  }
  0xf7   :  { %2790 = vmatpush1.bf16.msra.mxu0 %v4042_v9  ;;  %2576 = vmatprep.subr.bf16.mxu1 %v4047_v10  ;;  %v4120_v9 = vld [vmem:[#allocation5 + $0x7a0] ss:$8 sps:$4 sm:$0xff]   ;;  %v4125_v10 = vld [vmem:[#allocation5 + $0x2b4] ss:$8 sps:$4 sm:$0xff]  }
  0xf8   :  { %2791 = vmatprep.subr.bf16.mxu0 %v4050_v11  ;;  %v4128_v11 = vld [vmem:[#allocation5 + $0x7b4] ss:$8 sps:$4 sm:$0xff]  }
  0xfa   :  { %2577 = vmatpush1.bf16.msra.mxu1 %v4045_v12  ;;  %v4123_v12 = vld [vmem:[#allocation5 + $0x2b0] ss:$8 sps:$4 sm:$0xff]  }
  0xfb   :  { %2792 = vmatpush1.bf16.msra.mxu0 %v4048_v13  ;;  %2578 = vmatprep.subr.bf16.mxu1 %v4053_v14  ;;  %v4126_v13 = vld [vmem:[#allocation5 + $0x7b0] ss:$8 sps:$4 sm:$0xff]   ;;  %v4131_v14 = vld [vmem:[#allocation5 + $0x2c4] ss:$8 sps:$4 sm:$0xff]  }
  0xfc   :  { %2793 = vmatprep.subr.bf16.mxu0 %v4056_v15  ;;  %v4134_v15 = vld [vmem:[#allocation5 + $0x7c4] ss:$8 sps:$4 sm:$0xff]  }
  0xfe   :  { %2579 = vmatpush1.bf16.msra.mxu1 %v4051_v16  ;;  %v4129_v16 = vld [vmem:[#allocation5 + $0x2c0] ss:$8 sps:$4 sm:$0xff]  }
  0xff   :  { %2794 = vmatpush1.bf16.msra.mxu0 %v4054_v17  ;;  %2591 = vmatprep.subr.bf16.mxu1 %v4059_v19  ;;  %v4132_v17 = vld [vmem:[#allocation5 + $0x7c0] ss:$8 sps:$4 sm:$0xff]   ;;  %v4140_v19 = vld [vmem:[#allocation5 + $0x7d4] ss:$8 sps:$4 sm:$0xff]  }
 0x100   :  { %2806 = vmatprep.subr.bf16.mxu0 %v4062_v23  ;;  %v4146_v23 = vld [vmem:[#allocation5 + $0x7e4] ss:$8 sps:$4 sm:$0xff]  }
 0x101   :  { %2581 = vmatmul.mubr.bf16.vlgmr.msra.gmra.mrb[0].mxu1 %v167_v26  ;;  %v4149_v26 = vld [vmem:[#allocation5 + $0x2f4] ss:$8 sps:$4 sm:$0xff]  }
 0x102   :  { %2796 = vmatmul.mubr.bf16.vlgmr.msra.gmra.mrb[0].mxu0 %v177_v27  ;;  %2592 = vmatpush1.bf16.msra.mxu1 %v4057_v24  ;;  %v4141_v24 = vld [vmem:[#allocation5 + $0x2e0] ss:$8 sps:$4 sm:$0xff]   ;;  %v4152_v27 = vld [vmem:[#allocation5 + $0x7f4] ss:$8 sps:$4 sm:$0xff]  }
 0x103   :  { %2807 = vmatpush1.bf16.msra.mxu0 %v4060_v25  ;;  %2593 = vmatprep.subr.bf16.mxu1 %v4065_v28  ;;  %v4144_v25 = vld [vmem:[#allocation5 + $0x7e0] ss:$8 sps:$4 sm:$0xff]   ;;  %v4147_v28 = vld [vmem:[#allocation5 + $0x2f0] ss:$8 sps:$4 sm:$0xff]  }
 0x104   :  { %2808 = vmatprep.subr.bf16.mxu0 %v4068_v29  ;;  %2623 = vmatprep.mubr.bf16.mxu1 %v170_v36  ;;  %v4150_v29 = vld [vmem:[#allocation5 + $0x7f0] ss:$8 sps:$4 sm:$0xff]   ;;  %v4153_v36 = vld [vmem:[#allocation5 + $0x300] ss:$8 sps:$4 sm:$0xff]  }
 0x105   :  { %2838 = vmatprep.mubr.bf16.mxu0 %v180_v41 }
 0x106   :  { %2594 = vmatpush1.bf16.msra.mxu1 %v4063_v30  ;;  %v121_v30 = vld [vmem:[#allocation2 + $0x20] sm:$0xff] }
 0x107   :  { %2809 = vmatpush1.bf16.msra.mxu0 %v4066_v31  ;;  %2595 = vmatprep.subr.bf16.mxu1 %v4071_v32  ;;  %v4155_v31 = vld [vmem:[#allocation5 + $0x304] ss:$8 sps:$4 sm:$0xff]  }
 0x108   :  { %2810 = vmatprep.subr.bf16.mxu0 %v4074_v33  ;;  %v145_v32 = vld [vmem:[#allocation2 + $0xe0] sm:$0xff]  ;;  %v131_v33 = vld [vmem:[#allocation2 + $0x70] sm:$0xff] }
 0x109   :  { %v179_v41 = vpack.c.bf16 %v155_v34, %v131_v33  ;;  %v4234_v33 = vld [vmem:[#allocation5 + $0x8d0] ss:$8 sps:$4 sm:$0xff]   ;;  %v4239_v34 = vld [vmem:[#allocation5 + $0x3e4] ss:$8 sps:$4 sm:$0xff]  }
 0x10a   :  { %2596 = vmatpush1.bf16.msra.mxu1 %v4069_v37  ;;  %v4156_v37 = vld [vmem:[#allocation5 + $0x800] ss:$8 sps:$4 sm:$0xff]  }
 0x10b   :  { %2811 = vmatpush1.bf16.msra.mxu0 %v4072_v40  ;;  %2597 = vmatprep.subr.bf16.mxu1 %v4077_v42  ;;  %v169_v40 = vpack.c.bf16 %v145_v32, %v121_v30  ;;  %v134_v42 = vld [vmem:[#allocation2 + $0x88] sm:$0xff]  ;;  %v4233_v30 = vld [vmem:[#allocation5 + $0x3d4] ss:$8 sps:$4 sm:$0xff]   ;;  %v4231_v32 = vld [vmem:[#allocation5 + $0x3d0] ss:$8 sps:$4 sm:$0xff]  }
 0x10c   :  { %2812 = vmatprep.subr.bf16.mxu0 %v4080_v43  ;;  %v158_v43 = vld [vmem:[#allocation2 + $0x148] sm:$0xff] }
 0x10e   :  { %2598 = vmatpush1.bf16.msra.mxu1 %v4075_v44  ;;  %v4161_v44 = vld [vmem:[#allocation5 + $0x314] ss:$8 sps:$4 sm:$0xff]  }
 0x10f   :  { %2813 = vmatpush1.bf16.msra.mxu0 %v4078_v45  ;;  %2599 = vmatprep.subr.bf16.mxu1 %v4083_v46  ;;  %v4164_v45 = vld [vmem:[#allocation5 + $0x814] ss:$8 sps:$4 sm:$0xff]   ;;  %v172_v46 = vpack.c.bf16 %v148_v39, %v124_v38 }
 0x110   :  { %2814 = vmatprep.subr.bf16.mxu0 %v4086_v47  ;;  %v182_v47 = vpack.c.bf16 %v158_v43, %v134_v42  ;;  %v4245_v38 = vld [vmem:[#allocation5 + $0x3f4] ss:$8 sps:$4 sm:$0xff]  }
 0x111   :  { %v4248_v39 = vld [vmem:[#allocation5 + $0x8f4] ss:$8 sps:$4 sm:$0xff]  }
 0x112   :  { %2600 = vmatpush1.bf16.msra.mxu1 %v4081_v48  ;;  %v4159_v48 = vld [vmem:[#allocation5 + $0x310] ss:$8 sps:$4 sm:$0xff]  }
 0x113   :  { %2815 = vmatpush1.bf16.msra.mxu0 %v4084_v49  ;;  %2601 = vmatprep.subr.bf16.mxu1 %v4089_v50  ;;  %v4162_v49 = vld [vmem:[#allocation5 + $0x810] ss:$8 sps:$4 sm:$0xff]   ;;  %v4167_v50 = vld [vmem:[#allocation5 + $0x324] ss:$8 sps:$4 sm:$0xff]  }
 0x114   :  { %2816 = vmatprep.subr.bf16.mxu0 %v4092_v51  ;;  %v4170_v51 = vld [vmem:[#allocation5 + $0x824] ss:$8 sps:$4 sm:$0xff]   ;;  %v123_v42 = vld [vmem:[#allocation2 + $0x30] sm:$0xff] }
 0x115   :  { %v147_v43 = vld [vmem:[#allocation2 + $0xf0] sm:$0xff] }
 0x116   :  { %2602 = vmatpush1.bf16.msra.mxu1 %v4087_v52  ;;  %v4165_v52 = vld [vmem:[#allocation5 + $0x320] ss:$8 sps:$4 sm:$0xff]  }
 0x117   :  { %2817 = vmatpush1.bf16.msra.mxu0 %v4090_v53  ;;  %2603 = vmatprep.subr.bf16.mxu1 %v4095_v54  ;;  %v4168_v53 = vld [vmem:[#allocation5 + $0x820] ss:$8 sps:$4 sm:$0xff]   ;;  %v4173_v54 = vld [vmem:[#allocation5 + $0x334] ss:$8 sps:$4 sm:$0xff]  }
 0x118   :  { %2818 = vmatprep.subr.bf16.mxu0 %v4098_v55  ;;  %v4176_v55 = vld [vmem:[#allocation5 + $0x834] ss:$8 sps:$4 sm:$0xff]  }
 0x11a   :  { %2604 = vmatpush1.bf16.msra.mxu1 %v4093_v56  ;;  %v4171_v56 = vld [vmem:[#allocation5 + $0x330] ss:$8 sps:$4 sm:$0xff]  }
 0x11b   :  { %2819 = vmatpush1.bf16.msra.mxu0 %v4096_v57  ;;  %2605 = vmatprep.subr.bf16.mxu1 %v4101_v58  ;;  %v4174_v57 = vld [vmem:[#allocation5 + $0x830] ss:$8 sps:$4 sm:$0xff]   ;;  %v4179_v58 = vld [vmem:[#allocation5 + $0x344] ss:$8 sps:$4 sm:$0xff]  }
 0x11c   :  { %2820 = vmatprep.subr.bf16.mxu0 %v4104_v59  ;;  %v4182_v59 = vld [vmem:[#allocation5 + $0x844] ss:$8 sps:$4 sm:$0xff]  }
 0x11e   :  { %2606 = vmatpush1.bf16.msra.mxu1 %v4099_v60  ;;  %v4177_v60 = vld [vmem:[#allocation5 + $0x340] ss:$8 sps:$4 sm:$0xff]  }
 0x11f   :  { %2821 = vmatpush1.bf16.msra.mxu0 %v4102_v61  ;;  %2607 = vmatprep.subr.bf16.mxu1 %v4107_v62  ;;  %v4180_v61 = vld [vmem:[#allocation5 + $0x840] ss:$8 sps:$4 sm:$0xff]   ;;  %v4185_v62 = vld [vmem:[#allocation5 + $0x354] ss:$8 sps:$4 sm:$0xff]  }
 0x120   :  { %2822 = vmatprep.subr.bf16.mxu0 %v4110_v63  ;;  %v4188_v63 = vld [vmem:[#allocation5 + $0x854] ss:$8 sps:$4 sm:$0xff]  }
 0x122   :  { %2608 = vmatpush1.bf16.msra.mxu1 %v4105_v0  ;;  %v4183_v0 = vld [vmem:[#allocation5 + $0x350] ss:$8 sps:$4 sm:$0xff]  }
 0x123   :  { %2823 = vmatpush1.bf16.msra.mxu0 %v4108_v1  ;;  %2609 = vmatprep.subr.bf16.mxu1 %v4113_v2  ;;  %v4186_v1 = vld [vmem:[#allocation5 + $0x850] ss:$8 sps:$4 sm:$0xff]   ;;  %v4191_v2 = vld [vmem:[#allocation5 + $0x364] ss:$8 sps:$4 sm:$0xff]  }
 0x124   :  { %2824 = vmatprep.subr.bf16.mxu0 %v4116_v3  ;;  %v4194_v3 = vld [vmem:[#allocation5 + $0x864] ss:$8 sps:$4 sm:$0xff]  }
 0x126   :  { %2610 = vmatpush1.bf16.msra.mxu1 %v4111_v4  ;;  %v4189_v4 = vld [vmem:[#allocation5 + $0x360] ss:$8 sps:$4 sm:$0xff]  }
 0x127   :  { %2825 = vmatpush1.bf16.msra.mxu0 %v4114_v5  ;;  %2611 = vmatprep.subr.bf16.mxu1 %v4119_v6  ;;  %v4192_v5 = vld [vmem:[#allocation5 + $0x860] ss:$8 sps:$4 sm:$0xff]   ;;  %v4197_v6 = vld [vmem:[#allocation5 + $0x374] ss:$8 sps:$4 sm:$0xff]  }
 0x128   :  { %2826 = vmatprep.subr.bf16.mxu0 %v4122_v7  ;;  %v4200_v7 = vld [vmem:[#allocation5 + $0x874] ss:$8 sps:$4 sm:$0xff]  }
 0x12a   :  { %2612 = vmatpush1.bf16.msra.mxu1 %v4117_v8  ;;  %v4195_v8 = vld [vmem:[#allocation5 + $0x370] ss:$8 sps:$4 sm:$0xff]  }
 0x12b   :  { %2827 = vmatpush1.bf16.msra.mxu0 %v4120_v9  ;;  %2613 = vmatprep.subr.bf16.mxu1 %v4125_v10  ;;  %v4198_v9 = vld [vmem:[#allocation5 + $0x870] ss:$8 sps:$4 sm:$0xff]   ;;  %v4203_v10 = vld [vmem:[#allocation5 + $0x384] ss:$8 sps:$4 sm:$0xff]  }
 0x12c   :  { %2828 = vmatprep.subr.bf16.mxu0 %v4128_v11  ;;  %v4206_v11 = vld [vmem:[#allocation5 + $0x884] ss:$8 sps:$4 sm:$0xff]  }
 0x12e   :  { %2614 = vmatpush1.bf16.msra.mxu1 %v4123_v12  ;;  %v4201_v12 = vld [vmem:[#allocation5 + $0x380] ss:$8 sps:$4 sm:$0xff]  }
 0x12f   :  { %2829 = vmatpush1.bf16.msra.mxu0 %v4126_v13  ;;  %2615 = vmatprep.subr.bf16.mxu1 %v4131_v14  ;;  %v4204_v13 = vld [vmem:[#allocation5 + $0x880] ss:$8 sps:$4 sm:$0xff]   ;;  %v4209_v14 = vld [vmem:[#allocation5 + $0x394] ss:$8 sps:$4 sm:$0xff]  }
 0x130   :  { %2830 = vmatprep.subr.bf16.mxu0 %v4134_v15  ;;  %v4212_v15 = vld [vmem:[#allocation5 + $0x894] ss:$8 sps:$4 sm:$0xff]  }
 0x132   :  { %2616 = vmatpush1.bf16.msra.mxu1 %v4129_v16  ;;  %v4207_v16 = vld [vmem:[#allocation5 + $0x390] ss:$8 sps:$4 sm:$0xff]  }
 0x133   :  { %2831 = vmatpush1.bf16.msra.mxu0 %v4132_v17  ;;  %2617 = vmatprep.subr.bf16.mxu1 %v4137_v18  ;;  %v4210_v17 = vld [vmem:[#allocation5 + $0x890] ss:$8 sps:$4 sm:$0xff]   ;;  %v4215_v18 = vld [vmem:[#allocation5 + $0x3a4] ss:$8 sps:$4 sm:$0xff]  }
 0x134   :  { %2832 = vmatprep.subr.bf16.mxu0 %v4140_v19  ;;  %v4218_v19 = vld [vmem:[#allocation5 + $0x8a4] ss:$8 sps:$4 sm:$0xff]  }
 0x136   :  { %2618 = vmatpush1.bf16.msra.mxu1 %v4135_v20  ;;  %v4213_v20 = vld [vmem:[#allocation5 + $0x3a0] ss:$8 sps:$4 sm:$0xff]  }
 0x137   :  { %2833 = vmatpush1.bf16.msra.mxu0 %v4138_v21  ;;  %2619 = vmatprep.subr.bf16.mxu1 %v4143_v22  ;;  %v4216_v21 = vld [vmem:[#allocation5 + $0x8a0] ss:$8 sps:$4 sm:$0xff]   ;;  %v4221_v22 = vld [vmem:[#allocation5 + $0x3b4] ss:$8 sps:$4 sm:$0xff]  }
 0x138   :  { %2834 = vmatprep.subr.bf16.mxu0 %v4146_v23  ;;  %v4224_v23 = vld [vmem:[#allocation5 + $0x8b4] ss:$8 sps:$4 sm:$0xff]  }
 0x13a   :  { %2620 = vmatpush1.bf16.msra.mxu1 %v4141_v24  ;;  %v4219_v24 = vld [vmem:[#allocation5 + $0x3b0] ss:$8 sps:$4 sm:$0xff]  }
 0x13b   :  { %2835 = vmatpush1.bf16.msra.mxu0 %v4144_v25  ;;  %2621 = vmatprep.subr.bf16.mxu1 %v4149_v26  ;;  %v4222_v25 = vld [vmem:[#allocation5 + $0x8b0] ss:$8 sps:$4 sm:$0xff]   ;;  %v4227_v26 = vld [vmem:[#allocation5 + $0x3c4] ss:$8 sps:$4 sm:$0xff]  }
 0x13c   :  { %2836 = vmatprep.subr.bf16.mxu0 %v4152_v27  ;;  %v4230_v27 = vld [vmem:[#allocation5 + $0x8c4] ss:$8 sps:$4 sm:$0xff]  }
 0x13e   :  { %2622 = vmatpush1.bf16.msra.mxu1 %v4147_v28  ;;  %v4225_v28 = vld [vmem:[#allocation5 + $0x3c0] ss:$8 sps:$4 sm:$0xff]  }
 0x13f   :  { %2837 = vmatpush1.bf16.msra.mxu0 %v4150_v29  ;;  %2634 = vmatprep.subr.bf16.mxu1 %v4155_v31  ;;  %v4228_v29 = vld [vmem:[#allocation5 + $0x8c0] ss:$8 sps:$4 sm:$0xff]   ;;  %v4236_v31 = vld [vmem:[#allocation5 + $0x8d4] ss:$8 sps:$4 sm:$0xff]  }
 0x140   :  { %2849 = vmatprep.subr.bf16.mxu0 %v4158_v35  ;;  %v4242_v35 = vld [vmem:[#allocation5 + $0x8e4] ss:$8 sps:$4 sm:$0xff]  }
 0x141   :  { %2624 = vmatmul.mubr.bf16.vlgmr.msra.gmra.mrb[0].mxu1 %v169_v40  ;;  %v4243_v40 = vld [vmem:[#allocation5 + $0x3f0] ss:$8 sps:$4 sm:$0xff]  }
 0x142   :  { %2839 = vmatmul.mubr.bf16.vlgmr.msra.gmra.mrb[0].mxu0 %v179_v41  ;;  %2635 = vmatpush1.bf16.msra.mxu1 %v4153_v36  ;;  %v4237_v36 = vld [vmem:[#allocation5 + $0x3e0] ss:$8 sps:$4 sm:$0xff]   ;;  %v4246_v41 = vld [vmem:[#allocation5 + $0x8f0] ss:$8 sps:$4 sm:$0xff]  }
 0x143   :  { %2850 = vmatpush1.bf16.msra.mxu0 %v4156_v37  ;;  %2636 = vmatprep.subr.bf16.mxu1 %v4161_v44  ;;  %v4240_v37 = vld [vmem:[#allocation5 + $0x8e0] ss:$8 sps:$4 sm:$0xff]   ;;  %v4251_v44 = vld [vmem:[#allocation5 + $0x404] ss:$8 sps:$4 sm:$0xff]  }
 0x144   :  { %2851 = vmatprep.subr.bf16.mxu0 %v4164_v45  ;;  %2666 = vmatprep.mubr.bf16.mxu1 %v172_v46  ;;  %v4254_v45 = vld [vmem:[#allocation5 + $0x904] ss:$8 sps:$4 sm:$0xff]  }
 0x145   :  { %2881 = vmatprep.mubr.bf16.mxu0 %v182_v47  ;;  %v133_v46 = vld [vmem:[#allocation2 + $0x80] sm:$0xff] }
 0x146   :  { %2637 = vmatpush1.bf16.msra.mxu1 %v4159_v48  ;;  %v157_v47 = vld [vmem:[#allocation2 + $0x140] sm:$0xff]  ;;  %v126_v48 = vld [vmem:[#allocation2 + $0x48] sm:$0xff] }
 0x147   :  { %2852 = vmatpush1.bf16.msra.mxu0 %v4162_v49  ;;  %2638 = vmatprep.subr.bf16.mxu1 %v4167_v50  ;;  %v150_v49 = vld [vmem:[#allocation2 + $0x108] sm:$0xff]  ;;  %v136_v50 = vld [vmem:[#allocation2 + $0x98] sm:$0xff] }
 0x148   :  { %2853 = vmatprep.subr.bf16.mxu0 %v4170_v51  ;;  %v160_v51 = vld [vmem:[#allocation2 + $0x158] sm:$0xff] }
 0x14a   :  { %2639 = vmatpush1.bf16.msra.mxu1 %v4165_v52  ;;  %v171_v52 = vpack.c.bf16 %v147_v43, %v123_v42  ;;  %v4329_v42 = vld [vmem:[#allocation5 + $0x4d4] ss:$8 sps:$4 sm:$0xff]  }
 0x14b   :  { %2854 = vmatpush1.bf16.msra.mxu0 %v4168_v53  ;;  %2640 = vmatprep.subr.bf16.mxu1 %v4173_v54  ;;  %v181_v53 = vpack.c.bf16 %v157_v47, %v133_v46  ;;  %v4249_v54 = vld [vmem:[#allocation5 + $0x400] ss:$8 sps:$4 sm:$0xff]   ;;  %v4332_v43 = vld [vmem:[#allocation5 + $0x9d4] ss:$8 sps:$4 sm:$0xff]   ;;  %v4335_v46 = vld [vmem:[#allocation5 + $0x4e4] ss:$8 sps:$4 sm:$0xff]  }
 0x14c   :  { %2855 = vmatprep.subr.bf16.mxu0 %v4176_v55  ;;  %v4252_v55 = vld [vmem:[#allocation5 + $0x900] ss:$8 sps:$4 sm:$0xff]   ;;  %v4338_v47 = vld [vmem:[#allocation5 + $0x9e4] ss:$8 sps:$4 sm:$0xff]  }
 0x14e   :  { %2641 = vmatpush1.bf16.msra.mxu1 %v4171_v56  ;;  %v4257_v56 = vld [vmem:[#allocation5 + $0x414] ss:$8 sps:$4 sm:$0xff]  }
 0x14f   :  { %2856 = vmatpush1.bf16.msra.mxu0 %v4174_v57  ;;  %2642 = vmatprep.subr.bf16.mxu1 %v4179_v58  ;;  %v4260_v57 = vld [vmem:[#allocation5 + $0x914] ss:$8 sps:$4 sm:$0xff]   ;;  %v4255_v58 = vld [vmem:[#allocation5 + $0x410] ss:$8 sps:$4 sm:$0xff]  }
 0x150   :  { %2857 = vmatprep.subr.bf16.mxu0 %v4182_v59  ;;  %v4258_v59 = vld [vmem:[#allocation5 + $0x910] ss:$8 sps:$4 sm:$0xff]  }
 0x152   :  { %2643 = vmatpush1.bf16.msra.mxu1 %v4177_v60  ;;  %v174_v60 = vpack.c.bf16 %v150_v49, %v126_v48  ;;  %v4333_v48 = vld [vmem:[#allocation5 + $0x4e0] ss:$8 sps:$4 sm:$0xff]  }
 0x153   :  { %2858 = vmatpush1.bf16.msra.mxu0 %v4180_v61  ;;  %2644 = vmatprep.subr.bf16.mxu1 %v4185_v62  ;;  %v184_v61 = vpack.c.bf16 %v160_v51, %v136_v50  ;;  %v4263_v62 = vld [vmem:[#allocation5 + $0x424] ss:$8 sps:$4 sm:$0xff]   ;;  %v4336_v49 = vld [vmem:[#allocation5 + $0x9e0] ss:$8 sps:$4 sm:$0xff]   ;;  %v4341_v50 = vld [vmem:[#allocation5 + $0x4f4] ss:$8 sps:$4 sm:$0xff]  }
 0x154   :  { %2859 = vmatprep.subr.bf16.mxu0 %v4188_v63  ;;  %v4266_v63 = vld [vmem:[#allocation5 + $0x924] ss:$8 sps:$4 sm:$0xff]   ;;  %v4344_v51 = vld [vmem:[#allocation5 + $0x9f4] ss:$8 sps:$4 sm:$0xff]  }
 0x156   :  { %2645 = vmatpush1.bf16.msra.mxu1 %v4183_v0  ;;  %v4261_v0 = vld [vmem:[#allocation5 + $0x420] ss:$8 sps:$4 sm:$0xff]  }
 0x157   :  { %2860 = vmatpush1.bf16.msra.mxu0 %v4186_v1  ;;  %2646 = vmatprep.subr.bf16.mxu1 %v4191_v2  ;;  %v4264_v1 = vld [vmem:[#allocation5 + $0x920] ss:$8 sps:$4 sm:$0xff]   ;;  %v4269_v2 = vld [vmem:[#allocation5 + $0x434] ss:$8 sps:$4 sm:$0xff]  }
 0x158   :  { %2861 = vmatprep.subr.bf16.mxu0 %v4194_v3  ;;  %v4272_v3 = vld [vmem:[#allocation5 + $0x934] ss:$8 sps:$4 sm:$0xff]  }
 0x15a   :  { %2647 = vmatpush1.bf16.msra.mxu1 %v4189_v4  ;;  %v4267_v4 = vld [vmem:[#allocation5 + $0x430] ss:$8 sps:$4 sm:$0xff]  }
 0x15b   :  { %2862 = vmatpush1.bf16.msra.mxu0 %v4192_v5  ;;  %2648 = vmatprep.subr.bf16.mxu1 %v4197_v6  ;;  %v4270_v5 = vld [vmem:[#allocation5 + $0x930] ss:$8 sps:$4 sm:$0xff]   ;;  %v4275_v6 = vld [vmem:[#allocation5 + $0x444] ss:$8 sps:$4 sm:$0xff]  }
 0x15c   :  { %2863 = vmatprep.subr.bf16.mxu0 %v4200_v7  ;;  %v4278_v7 = vld [vmem:[#allocation5 + $0x944] ss:$8 sps:$4 sm:$0xff]  }
 0x15e   :  { %2649 = vmatpush1.bf16.msra.mxu1 %v4195_v8  ;;  %v4273_v8 = vld [vmem:[#allocation5 + $0x440] ss:$8 sps:$4 sm:$0xff]  }
 0x15f   :  { %2864 = vmatpush1.bf16.msra.mxu0 %v4198_v9  ;;  %2650 = vmatprep.subr.bf16.mxu1 %v4203_v10  ;;  %v4276_v9 = vld [vmem:[#allocation5 + $0x940] ss:$8 sps:$4 sm:$0xff]   ;;  %v4281_v10 = vld [vmem:[#allocation5 + $0x454] ss:$8 sps:$4 sm:$0xff]  }
 0x160   :  { %2865 = vmatprep.subr.bf16.mxu0 %v4206_v11  ;;  %v4284_v11 = vld [vmem:[#allocation5 + $0x954] ss:$8 sps:$4 sm:$0xff]  }
 0x162   :  { %2651 = vmatpush1.bf16.msra.mxu1 %v4201_v12  ;;  %v4279_v12 = vld [vmem:[#allocation5 + $0x450] ss:$8 sps:$4 sm:$0xff]  }
 0x163   :  { %2866 = vmatpush1.bf16.msra.mxu0 %v4204_v13  ;;  %2652 = vmatprep.subr.bf16.mxu1 %v4209_v14  ;;  %v4282_v13 = vld [vmem:[#allocation5 + $0x950] ss:$8 sps:$4 sm:$0xff]   ;;  %v4287_v14 = vld [vmem:[#allocation5 + $0x464] ss:$8 sps:$4 sm:$0xff]  }
 0x164   :  { %2867 = vmatprep.subr.bf16.mxu0 %v4212_v15  ;;  %v4290_v15 = vld [vmem:[#allocation5 + $0x964] ss:$8 sps:$4 sm:$0xff]  }
 0x166   :  { %2653 = vmatpush1.bf16.msra.mxu1 %v4207_v16  ;;  %v4285_v16 = vld [vmem:[#allocation5 + $0x460] ss:$8 sps:$4 sm:$0xff]  }
 0x167   :  { %2868 = vmatpush1.bf16.msra.mxu0 %v4210_v17  ;;  %2654 = vmatprep.subr.bf16.mxu1 %v4215_v18  ;;  %v4288_v17 = vld [vmem:[#allocation5 + $0x960] ss:$8 sps:$4 sm:$0xff]   ;;  %v4293_v18 = vld [vmem:[#allocation5 + $0x474] ss:$8 sps:$4 sm:$0xff]  }
 0x168   :  { %2869 = vmatprep.subr.bf16.mxu0 %v4218_v19  ;;  %v4296_v19 = vld [vmem:[#allocation5 + $0x974] ss:$8 sps:$4 sm:$0xff]  }
 0x16a   :  { %2655 = vmatpush1.bf16.msra.mxu1 %v4213_v20  ;;  %v4291_v20 = vld [vmem:[#allocation5 + $0x470] ss:$8 sps:$4 sm:$0xff]  }
 0x16b   :  { %2870 = vmatpush1.bf16.msra.mxu0 %v4216_v21  ;;  %2656 = vmatprep.subr.bf16.mxu1 %v4221_v22  ;;  %v4294_v21 = vld [vmem:[#allocation5 + $0x970] ss:$8 sps:$4 sm:$0xff]   ;;  %v4299_v22 = vld [vmem:[#allocation5 + $0x484] ss:$8 sps:$4 sm:$0xff]  }
 0x16c   :  { %2871 = vmatprep.subr.bf16.mxu0 %v4224_v23  ;;  %v4302_v23 = vld [vmem:[#allocation5 + $0x984] ss:$8 sps:$4 sm:$0xff]  }
 0x16e   :  { %2657 = vmatpush1.bf16.msra.mxu1 %v4219_v24  ;;  %v4297_v24 = vld [vmem:[#allocation5 + $0x480] ss:$8 sps:$4 sm:$0xff]  }
 0x16f   :  { %2872 = vmatpush1.bf16.msra.mxu0 %v4222_v25  ;;  %2658 = vmatprep.subr.bf16.mxu1 %v4227_v26  ;;  %v4300_v25 = vld [vmem:[#allocation5 + $0x980] ss:$8 sps:$4 sm:$0xff]   ;;  %v4305_v26 = vld [vmem:[#allocation5 + $0x494] ss:$8 sps:$4 sm:$0xff]  }
 0x170   :  { %2873 = vmatprep.subr.bf16.mxu0 %v4230_v27  ;;  %v4308_v27 = vld [vmem:[#allocation5 + $0x994] ss:$8 sps:$4 sm:$0xff]  }
 0x172   :  { %2659 = vmatpush1.bf16.msra.mxu1 %v4225_v28  ;;  %v4303_v28 = vld [vmem:[#allocation5 + $0x490] ss:$8 sps:$4 sm:$0xff]  }
 0x173   :  { %2874 = vmatpush1.bf16.msra.mxu0 %v4228_v29  ;;  %2660 = vmatprep.subr.bf16.mxu1 %v4233_v30  ;;  %v4306_v29 = vld [vmem:[#allocation5 + $0x990] ss:$8 sps:$4 sm:$0xff]   ;;  %v4311_v30 = vld [vmem:[#allocation5 + $0x4a4] ss:$8 sps:$4 sm:$0xff]  }
 0x174   :  { %2875 = vmatprep.subr.bf16.mxu0 %v4236_v31  ;;  %v4314_v31 = vld [vmem:[#allocation5 + $0x9a4] ss:$8 sps:$4 sm:$0xff]  }
 0x176   :  { %2661 = vmatpush1.bf16.msra.mxu1 %v4231_v32  ;;  %v4309_v32 = vld [vmem:[#allocation5 + $0x4a0] ss:$8 sps:$4 sm:$0xff]  }
 0x177   :  { %2876 = vmatpush1.bf16.msra.mxu0 %v4234_v33  ;;  %2662 = vmatprep.subr.bf16.mxu1 %v4239_v34  ;;  %v4312_v33 = vld [vmem:[#allocation5 + $0x9a0] ss:$8 sps:$4 sm:$0xff]   ;;  %v4317_v34 = vld [vmem:[#allocation5 + $0x4b4] ss:$8 sps:$4 sm:$0xff]  }
 0x178   :  { %2877 = vmatprep.subr.bf16.mxu0 %v4242_v35  ;;  %v4320_v35 = vld [vmem:[#allocation5 + $0x9b4] ss:$8 sps:$4 sm:$0xff]  }
 0x17a   :  { %2663 = vmatpush1.bf16.msra.mxu1 %v4237_v36  ;;  %v4315_v36 = vld [vmem:[#allocation5 + $0x4b0] ss:$8 sps:$4 sm:$0xff]  }
 0x17b   :  { %2878 = vmatpush1.bf16.msra.mxu0 %v4240_v37  ;;  %2664 = vmatprep.subr.bf16.mxu1 %v4245_v38  ;;  %v4318_v37 = vld [vmem:[#allocation5 + $0x9b0] ss:$8 sps:$4 sm:$0xff]   ;;  %v4323_v38 = vld [vmem:[#allocation5 + $0x4c4] ss:$8 sps:$4 sm:$0xff]  }
 0x17c   :  { %2879 = vmatprep.subr.bf16.mxu0 %v4248_v39  ;;  %v4326_v39 = vld [vmem:[#allocation5 + $0x9c4] ss:$8 sps:$4 sm:$0xff]  }
 0x17e   :  { %2665 = vmatpush1.bf16.msra.mxu1 %v4243_v40  ;;  %v4321_v40 = vld [vmem:[#allocation5 + $0x4c0] ss:$8 sps:$4 sm:$0xff]  }
 0x17f   :  { %2880 = vmatpush1.bf16.msra.mxu0 %v4246_v41  ;;  %2677 = vmatprep.subr.bf16.mxu1 %v4251_v44  ;;  %v4324_v41 = vld [vmem:[#allocation5 + $0x9c0] ss:$8 sps:$4 sm:$0xff]   ;;  %v4327_v44 = vld [vmem:[#allocation5 + $0x4d0] ss:$8 sps:$4 sm:$0xff]  }
 0x180   :  { %2892 = vmatprep.subr.bf16.mxu0 %v4254_v45  ;;  %v4330_v45 = vld [vmem:[#allocation5 + $0x9d0] ss:$8 sps:$4 sm:$0xff]  }
 0x181   :  { %2667 = vmatmul.mubr.bf16.vlgmr.msra.gmra.mrb[0].mxu1 %v171_v52  ;;  %v4339_v52 = vld [vmem:[#allocation5 + $0x4f0] ss:$8 sps:$4 sm:$0xff]  }
 0x182   :  { %2882 = vmatmul.mubr.bf16.vlgmr.msra.gmra.mrb[0].mxu0 %v181_v53  ;;  %2678 = vmatpush1.bf16.msra.mxu1 %v4249_v54  ;;  %v4342_v53 = vld [vmem:[#allocation5 + $0x9f0] ss:$8 sps:$4 sm:$0xff]   ;;  %v125_v54 = vld [vmem:[#allocation2 + $0x40] sm:$0xff] }
 0x183   :  { %2893 = vmatpush1.bf16.msra.mxu0 %v4252_v55  ;;  %2679 = vmatprep.subr.bf16.mxu1 %v4257_v56  ;;  %v149_v55 = vld [vmem:[#allocation2 + $0x100] sm:$0xff]  ;;  %v135_v56 = vld [vmem:[#allocation2 + $0x90] sm:$0xff] }
 0x184   :  { %2894 = vmatprep.subr.bf16.mxu0 %v4260_v57  ;;  %2709 = vmatprep.mubr.bf16.mxu1 %v174_v60  ;;  %v159_v57 = vld [vmem:[#allocation2 + $0x150] sm:$0xff]  ;;  %v162_v60 = vld [vmem:[#allocation2 + $0x168] sm:$0xff] }
 0x185   :  { %2924 = vmatprep.mubr.bf16.mxu0 %v184_v61  ;;  %v173_v61 = vpack.c.bf16 %v149_v55, %v125_v54  ;;  %v4443_v54 = vld [vmem:[#allocation8 + $0x48] sm:$0xff]  }
 0x186   :  { %2680 = vmatpush1.bf16.msra.mxu1 %v4255_v58  ;;  %v4347_v58 = vld [vmem:[#allocation5 + $0xa04] ss:$8 sps:$4 sm:$0xff]   ;;  %v4414_v55 = vld [vmem:[#allocation5 + $0xb70] ss:$8 sps:$4 sm:$0xff]  }
 0x187   :  { %2895 = vmatpush1.bf16.msra.mxu0 %v4258_v59  ;;  %2681 = vmatprep.subr.bf16.mxu1 %v4263_v62  ;;  %v138_v59 = vld [vmem:[#allocation2 + $0xa8] sm:$0xff]  ;;  %v183_v62 = vpack.c.bf16 %v159_v57, %v135_v56 }
 0x188   :  { %2896 = vmatprep.subr.bf16.mxu0 %v4266_v63  ;;  %v4345_v63 = vld [vmem:[#allocation5 + $0xa00] ss:$8 sps:$4 sm:$0xff]   ;;  %v4419_v56 = vld [vmem:[#allocation5 + $0xb84] ss:$8 sps:$4 sm:$0xff]  }
 0x189   :  { %v4444_v57 = vld [vmem:[#allocation8 + $0x8] sm:$0xff]  }
 0x18a   :  { %2682 = vmatpush1.bf16.msra.mxu1 %v4261_v0  ;;  %v186_v0 = vpack.c.bf16 %v162_v60, %v138_v59  ;;  %v4417_v59 = vld [vmem:[#allocation5 + $0xb80] ss:$8 sps:$4 sm:$0xff]   ;;  %v4422_v60 = vld [vmem:[#allocation5 + $0xb94] ss:$8 sps:$4 sm:$0xff]  }
 0x18b   :  { %2897 = vmatpush1.bf16.msra.mxu0 %v4264_v1  ;;  %2683 = vmatprep.subr.bf16.mxu1 %v4269_v2  ;;  %v4350_v1 = vld [vmem:[#allocation5 + $0xa14] ss:$8 sps:$4 sm:$0xff]   ;;  %v4348_v2 = vld [vmem:[#allocation5 + $0xa10] ss:$8 sps:$4 sm:$0xff]  }
 0x18c   :  { %2898 = vmatprep.subr.bf16.mxu0 %v4272_v3  ;;  %v4353_v3 = vld [vmem:[#allocation5 + $0xa24] ss:$8 sps:$4 sm:$0xff]  }
 0x18e   :  { %2684 = vmatpush1.bf16.msra.mxu1 %v4267_v4  ;;  %v4351_v4 = vld [vmem:[#allocation5 + $0xa20] ss:$8 sps:$4 sm:$0xff]  }
 0x18f   :  { %2899 = vmatpush1.bf16.msra.mxu0 %v4270_v5  ;;  %2685 = vmatprep.subr.bf16.mxu1 %v4275_v6  ;;  %v4356_v5 = vld [vmem:[#allocation5 + $0xa34] ss:$8 sps:$4 sm:$0xff]   ;;  %v4354_v6 = vld [vmem:[#allocation5 + $0xa30] ss:$8 sps:$4 sm:$0xff]  }
 0x190   :  { %2900 = vmatprep.subr.bf16.mxu0 %v4278_v7  ;;  %v4359_v7 = vld [vmem:[#allocation5 + $0xa44] ss:$8 sps:$4 sm:$0xff]  }
 0x192   :  { %2686 = vmatpush1.bf16.msra.mxu1 %v4273_v8  ;;  %v4357_v8 = vld [vmem:[#allocation5 + $0xa40] ss:$8 sps:$4 sm:$0xff]  }
 0x193   :  { %2901 = vmatpush1.bf16.msra.mxu0 %v4276_v9  ;;  %2687 = vmatprep.subr.bf16.mxu1 %v4281_v10  ;;  %v4362_v9 = vld [vmem:[#allocation5 + $0xa54] ss:$8 sps:$4 sm:$0xff]   ;;  %v4360_v10 = vld [vmem:[#allocation5 + $0xa50] ss:$8 sps:$4 sm:$0xff]  }
 0x194   :  { %2902 = vmatprep.subr.bf16.mxu0 %v4284_v11  ;;  %v4365_v11 = vld [vmem:[#allocation5 + $0xa64] ss:$8 sps:$4 sm:$0xff]  }
 0x196   :  { %2688 = vmatpush1.bf16.msra.mxu1 %v4279_v12  ;;  %v4363_v12 = vld [vmem:[#allocation5 + $0xa60] ss:$8 sps:$4 sm:$0xff]  }
 0x197   :  { %2903 = vmatpush1.bf16.msra.mxu0 %v4282_v13  ;;  %2689 = vmatprep.subr.bf16.mxu1 %v4287_v14  ;;  %v4368_v13 = vld [vmem:[#allocation5 + $0xa74] ss:$8 sps:$4 sm:$0xff]   ;;  %v4366_v14 = vld [vmem:[#allocation5 + $0xa70] ss:$8 sps:$4 sm:$0xff]  }
 0x198   :  { %2904 = vmatprep.subr.bf16.mxu0 %v4290_v15  ;;  %v4371_v15 = vld [vmem:[#allocation5 + $0xa84] ss:$8 sps:$4 sm:$0xff]  }
 0x19a   :  { %2690 = vmatpush1.bf16.msra.mxu1 %v4285_v16  ;;  %v4369_v16 = vld [vmem:[#allocation5 + $0xa80] ss:$8 sps:$4 sm:$0xff]  }
 0x19b   :  { %2905 = vmatpush1.bf16.msra.mxu0 %v4288_v17  ;;  %2691 = vmatprep.subr.bf16.mxu1 %v4293_v18  ;;  %v4374_v17 = vld [vmem:[#allocation5 + $0xa94] ss:$8 sps:$4 sm:$0xff]   ;;  %v4372_v18 = vld [vmem:[#allocation5 + $0xa90] ss:$8 sps:$4 sm:$0xff]  }
 0x19c   :  { %2906 = vmatprep.subr.bf16.mxu0 %v4296_v19  ;;  %v4377_v19 = vld [vmem:[#allocation5 + $0xaa4] ss:$8 sps:$4 sm:$0xff]  }
 0x19e   :  { %2692 = vmatpush1.bf16.msra.mxu1 %v4291_v20  ;;  %v4375_v20 = vld [vmem:[#allocation5 + $0xaa0] ss:$8 sps:$4 sm:$0xff]  }
 0x19f   :  { %2907 = vmatpush1.bf16.msra.mxu0 %v4294_v21  ;;  %2693 = vmatprep.subr.bf16.mxu1 %v4299_v22  ;;  %v4380_v21 = vld [vmem:[#allocation5 + $0xab4] ss:$8 sps:$4 sm:$0xff]   ;;  %v4378_v22 = vld [vmem:[#allocation5 + $0xab0] ss:$8 sps:$4 sm:$0xff]  }
 0x1a0   :  { %2908 = vmatprep.subr.bf16.mxu0 %v4302_v23  ;;  %v4383_v23 = vld [vmem:[#allocation5 + $0xac4] ss:$8 sps:$4 sm:$0xff]  }
 0x1a2   :  { %2694 = vmatpush1.bf16.msra.mxu1 %v4297_v24  ;;  %v4381_v24 = vld [vmem:[#allocation5 + $0xac0] ss:$8 sps:$4 sm:$0xff]  }
 0x1a3   :  { %2909 = vmatpush1.bf16.msra.mxu0 %v4300_v25  ;;  %2695 = vmatprep.subr.bf16.mxu1 %v4305_v26  ;;  %v4386_v25 = vld [vmem:[#allocation5 + $0xad4] ss:$8 sps:$4 sm:$0xff]   ;;  %v4384_v26 = vld [vmem:[#allocation5 + $0xad0] ss:$8 sps:$4 sm:$0xff]  }
 0x1a4   :  { %2910 = vmatprep.subr.bf16.mxu0 %v4308_v27  ;;  %v4389_v27 = vld [vmem:[#allocation5 + $0xae4] ss:$8 sps:$4 sm:$0xff]  }
 0x1a6   :  { %2696 = vmatpush1.bf16.msra.mxu1 %v4303_v28  ;;  %v4387_v28 = vld [vmem:[#allocation5 + $0xae0] ss:$8 sps:$4 sm:$0xff]  }
 0x1a7   :  { %2911 = vmatpush1.bf16.msra.mxu0 %v4306_v29  ;;  %2697 = vmatprep.subr.bf16.mxu1 %v4311_v30  ;;  %v4392_v29 = vld [vmem:[#allocation5 + $0xaf4] ss:$8 sps:$4 sm:$0xff]   ;;  %v4390_v30 = vld [vmem:[#allocation5 + $0xaf0] ss:$8 sps:$4 sm:$0xff]  }
 0x1a8   :  { %2912 = vmatprep.subr.bf16.mxu0 %v4314_v31  ;;  %v137_v31 = vld [vmem:[#allocation2 + $0xa0] sm:$0xff] }
 0x1aa   :  { %2698 = vmatpush1.bf16.msra.mxu1 %v4309_v32  ;;  %v161_v32 = vld [vmem:[#allocation2 + $0x160] sm:$0xff] }
 0x1ab   :  { %2913 = vmatpush1.bf16.msra.mxu0 %v4312_v33  ;;  %2699 = vmatprep.subr.bf16.mxu1 %v4317_v34  ;;  %v4395_v33 = vld [vmem:[#allocation5 + $0xb04] ss:$8 sps:$4 sm:$0xff]   ;;  %v140_v34 = vld [vmem:[#allocation2 + $0xb8] sm:$0xff] }
 0x1ac   :  { %2914 = vmatprep.subr.bf16.mxu0 %v4320_v35  ;;  %v164_v35 = vld [vmem:[#allocation2 + $0x178] sm:$0xff] }
 0x1ae   :  { %2700 = vmatpush1.bf16.msra.mxu1 %v4315_v36  ;;  %v185_v36 = vpack.c.bf16 %v161_v32, %v137_v31  ;;  %v573_v32 = vld [vmem:[#allocation7] sm:$0x3] }
 0x1af   :  { %2915 = vmatpush1.bf16.msra.mxu0 %v4318_v37  ;;  %2701 = vmatprep.subr.bf16.mxu1 %v4323_v38  ;;  %v4393_v37 = vld [vmem:[#allocation5 + $0xb00] ss:$8 sps:$4 sm:$0xff]   ;;  %v188_v38 = vpack.c.bf16 %v164_v35, %v140_v34 }
 0x1b0   :  { %2916 = vmatprep.subr.bf16.mxu0 %v4326_v39  ;;  %v4398_v39 = vld [vmem:[#allocation5 + $0xb14] ss:$8 sps:$4 sm:$0xff]  }
 0x1b2   :  { %2702 = vmatpush1.bf16.msra.mxu1 %v4321_v40  ;;  %v4396_v40 = vld [vmem:[#allocation5 + $0xb10] ss:$8 sps:$4 sm:$0xff]  }
 0x1b3   :  { %2917 = vmatpush1.bf16.msra.mxu0 %v4324_v41  ;;  %2703 = vmatprep.subr.bf16.mxu1 %v4329_v42  ;;  %v4401_v41 = vld [vmem:[#allocation5 + $0xb24] ss:$8 sps:$4 sm:$0xff]   ;;  %v4399_v42 = vld [vmem:[#allocation5 + $0xb20] ss:$8 sps:$4 sm:$0xff]  }
 0x1b4   :  { %2918 = vmatprep.subr.bf16.mxu0 %v4332_v43  ;;  %v4404_v43 = vld [vmem:[#allocation5 + $0xb34] ss:$8 sps:$4 sm:$0xff]  }
 0x1b6   :  { %2704 = vmatpush1.bf16.msra.mxu1 %v4327_v44  ;;  %v4402_v44 = vld [vmem:[#allocation5 + $0xb30] ss:$8 sps:$4 sm:$0xff]  }
 0x1b7   :  { %2919 = vmatpush1.bf16.msra.mxu0 %v4330_v45  ;;  %2705 = vmatprep.subr.bf16.mxu1 %v4335_v46  ;;  %v4407_v45 = vld [vmem:[#allocation5 + $0xb44] ss:$8 sps:$4 sm:$0xff]   ;;  %v4405_v46 = vld [vmem:[#allocation5 + $0xb40] ss:$8 sps:$4 sm:$0xff]  }
 0x1b8   :  { %2920 = vmatprep.subr.bf16.mxu0 %v4338_v47  ;;  %v4410_v47 = vld [vmem:[#allocation5 + $0xb54] ss:$8 sps:$4 sm:$0xff]  }
 0x1ba   :  { %2706 = vmatpush1.bf16.msra.mxu1 %v4333_v48  ;;  %v4408_v48 = vld [vmem:[#allocation5 + $0xb50] ss:$8 sps:$4 sm:$0xff]  }
 0x1bb   :  { %2921 = vmatpush1.bf16.msra.mxu0 %v4336_v49  ;;  %2707 = vmatprep.subr.bf16.mxu1 %v4341_v50  ;;  %v4413_v49 = vld [vmem:[#allocation5 + $0xb64] ss:$8 sps:$4 sm:$0xff]   ;;  %v4411_v50 = vld [vmem:[#allocation5 + $0xb60] ss:$8 sps:$4 sm:$0xff]  }
 0x1bc   :  { %2922 = vmatprep.subr.bf16.mxu0 %v4344_v51  ;;  %v4416_v51 = vld [vmem:[#allocation5 + $0xb74] ss:$8 sps:$4 sm:$0xff]  }
 0x1be   :  { %2708 = vmatpush1.bf16.msra.mxu1 %v4339_v52  ;;  %v4441_v52 = vld [vmem:[#allocation8 + $0x40] sm:$0xff]  }
 0x1bf   :  { %2923 = vmatpush1.bf16.msra.mxu0 %v4342_v53  ;;  %v4442_v53 = vld [vmem:[#allocation8] sm:$0xff]   ;;  %3750 = vmatprep.subr.bf16.mxu1 %v4441_v52 }
 0x1c0   :  { %2935 = vmatprep.subr.bf16.mxu0 %v4347_v58  ;;  %v4445_v58 = vld [vmem:[#allocation8 + $0x50] sm:$0xff]  }
 0x1c1   :  { %2710 = vmatmul.mubr.bf16.vlgmr.msra.gmra.mrb[0].mxu1 %v173_v61  ;;  %v4446_v61 = vld [vmem:[#allocation8 + $0x10] sm:$0xff]  }
 0x1c2   :  { %2925 = vmatmul.mubr.bf16.vlgmr.msra.gmra.mrb[0].mxu0 %v183_v62  ;;  %3751 = vmatpush3.bf16.msra.mxu1 %v4442_v53  ;;  %v4447_v62 = vld [vmem:[#allocation8 + $0x58] sm:$0xff]  }
 0x1c3   :  { %2936 = vmatpush1.bf16.msra.mxu0 %v4345_v63  ;;  %2967 = vmatprep.mubr.bf16.mxu0 %v186_v0  ;;  %v4420_v63 = vld [vmem:[#allocation5 + $0xb90] ss:$8 sps:$4 sm:$0xff]   ;;  %v4425_v0 = vld [vmem:[#allocation5 + $0xba4] ss:$8 sps:$4 sm:$0xff]  }
 0x1c4   :  { %2937 = vmatprep.subr.bf16.mxu0 %v4350_v1  ;;  %3752 = vmatprep.subr.bf16.mxu1 %v4443_v54  ;;  %v4448_v1 = vld [vmem:[#allocation8 + $0x18] sm:$0xff]   ;;  %v4457_v54 = vld [vmem:[#allocation11] sm:$0xff]  }
 0x1c6   :  { %3753 = vmatpush3.bf16.msra.mxu1 %v4444_v57  ;;  %v4460_v57 = vld [vmem:[#allocation11 + $0x18] sm:$0xff]  }
 0x1c7   :  { %2938 = vmatpush1.bf16.msra.mxu0 %v4348_v2  ;;  %3754 = vmatprep.subr.bf16.mxu1 %v4445_v58  ;;  %v4449_v2 = vld [vmem:[#allocation8 + $0x60] sm:$0xff]  }
 0x1c8   :  { %2939 = vmatprep.subr.bf16.mxu0 %v4353_v3  ;;  %v4423_v3 = vld [vmem:[#allocation5 + $0xba0] ss:$8 sps:$4 sm:$0xff]  }
 0x1c9   :  { %v4461_v58 = vld [vmem:[#allocation11 + $0x20] sm:$0xff]  }
 0x1ca   :  { %3755 = vmatpush3.bf16.msra.mxu1 %v4446_v61  ;;  %v4464_v61 = vld [vmem:[#allocation11 + $0x38] sm:$0xff]  }
 0x1cb   :  { %2940 = vmatpush1.bf16.msra.mxu0 %v4351_v4  ;;  %3756 = vmatprep.subr.bf16.mxu1 %v4447_v62  ;;  %v4428_v4 = vld [vmem:[#allocation5 + $0xbb4] ss:$8 sps:$4 sm:$0xff]  }
 0x1cc   :  { %2941 = vmatprep.subr.bf16.mxu0 %v4356_v5  ;;  %v4450_v5 = vld [vmem:[#allocation8 + $0x20] sm:$0xff]  }
 0x1ce   :  { %3757 = vmatpush3.bf16.msra.mxu1 %v4448_v1 }
 0x1cf   :  { %2942 = vmatpush1.bf16.msra.mxu0 %v4354_v6  ;;  %3758 = vmatprep.subr.bf16.mxu1 %v4449_v2  ;;  %v4451_v6 = vld [vmem:[#allocation8 + $0x68] sm:$0xff]  }
 0x1d0   :  { %2943 = vmatprep.subr.bf16.mxu0 %v4359_v7  ;;  %v4426_v7 = vld [vmem:[#allocation5 + $0xbb0] ss:$8 sps:$4 sm:$0xff]  }
 0x1d2   :  { %3759 = vmatpush3.bf16.msra.mxu1 %v4450_v5 }
 0x1d3   :  { %2944 = vmatpush1.bf16.msra.mxu0 %v4357_v8  ;;  %v4431_v8 = vld [vmem:[#allocation5 + $0xbc4] ss:$8 sps:$4 sm:$0xff]   ;;  %3760 = vmatprep.subr.bf16.mxu1 %v4451_v6 }
 0x1d4   :  { %2945 = vmatprep.subr.bf16.mxu0 %v4362_v9  ;;  %v4429_v9 = vld [vmem:[#allocation5 + $0xbc0] ss:$8 sps:$4 sm:$0xff]  }
 0x1d7   :  { %2946 = vmatpush1.bf16.msra.mxu0 %v4360_v10  ;;  %v4434_v10 = vld [vmem:[#allocation5 + $0xbd4] ss:$8 sps:$4 sm:$0xff]  }
 0x1d8   :  { %2947 = vmatprep.subr.bf16.mxu0 %v4365_v11  ;;  %v4432_v11 = vld [vmem:[#allocation5 + $0xbd0] ss:$8 sps:$4 sm:$0xff]  }
 0x1db   :  { %2948 = vmatpush1.bf16.msra.mxu0 %v4363_v12  ;;  %v4437_v12 = vld [vmem:[#allocation5 + $0xbe4] ss:$8 sps:$4 sm:$0xff]  }
 0x1dc   :  { %2949 = vmatprep.subr.bf16.mxu0 %v4368_v13  ;;  %v4435_v13 = vld [vmem:[#allocation5 + $0xbe0] ss:$8 sps:$4 sm:$0xff]  }
 0x1df   :  { %2950 = vmatpush1.bf16.msra.mxu0 %v4366_v14  ;;  %v4440_v14 = vld [vmem:[#allocation5 + $0xbf4] ss:$8 sps:$4 sm:$0xff]  }
 0x1e0   :  { %2951 = vmatprep.subr.bf16.mxu0 %v4371_v15  ;;  %v4438_v15 = vld [vmem:[#allocation5 + $0xbf0] ss:$8 sps:$4 sm:$0xff]  }
 0x1e3   :  { %2952 = vmatpush1.bf16.msra.mxu0 %v4369_v16  ;;  %v139_v16 = vld [vmem:[#allocation2 + $0xb0] sm:$0xff] }
 0x1e4   :  { %2953 = vmatprep.subr.bf16.mxu0 %v4374_v17  ;;  %v163_v17 = vld [vmem:[#allocation2 + $0x170] sm:$0xff] }
 0x1e7   :  { %2954 = vmatpush1.bf16.msra.mxu0 %v4372_v18  ;;  %v187_v18 = vpack.c.bf16 %v163_v17, %v139_v16 }
 0x1e8   :  { %2955 = vmatprep.subr.bf16.mxu0 %v4377_v19  ;;  %v4452_v19 = vld [vmem:[#allocation8 + $0x28] sm:$0xff]  }
 0x1e9   :  { %3761 = vmatpush3.bf16.msra.mxu1 %v4452_v19 }
 0x1eb   :  { %2956 = vmatpush1.bf16.msra.mxu0 %v4375_v20 }
 0x1ec   :  { %2957 = vmatprep.subr.bf16.mxu0 %v4380_v21 }
 0x1ef   :  { %2958 = vmatpush1.bf16.msra.mxu0 %v4378_v22  ;;  %v4453_v22 = vld [vmem:[#allocation8 + $0x70] sm:$0xff]  }
 0x1f0   :  { %2959 = vmatprep.subr.bf16.mxu0 %v4383_v23  ;;  %3762 = vmatprep.subr.bf16.mxu1 %v4453_v22 }
 0x1f3   :  { %2960 = vmatpush1.bf16.msra.mxu0 %v4381_v24  ;;  %v4454_v24 = vld [vmem:[#allocation8 + $0x30] sm:$0xff]  }
 0x1f4   :  { %2961 = vmatprep.subr.bf16.mxu0 %v4386_v25  ;;  %3763 = vmatpush3.bf16.msra.mxu1 %v4454_v24 }
 0x1f7   :  { %2962 = vmatpush1.bf16.msra.mxu0 %v4384_v26  ;;  %v4455_v26 = vld [vmem:[#allocation8 + $0x78] sm:$0xff]  }
 0x1f8   :  { %2963 = vmatprep.subr.bf16.mxu0 %v4389_v27  ;;  %v4456_v27 = vld [vmem:[#allocation8 + $0x38] sm:$0xff]   ;;  %3764 = vmatprep.subr.bf16.mxu1 %v4455_v26 }
 0x1f9   :  { %3765 = vmatpush3.bf16.msra.mxu1 %v4456_v27 }
 0x1fb   :  { %2964 = vmatpush1.bf16.msra.mxu0 %v4387_v28  ;;  %v4664_v28 = vmov 0.0  }
 0x1fc   :  { %2965 = vmatprep.subr.bf16.mxu0 %v4392_v29  ;;  %3781 = vmatprep.subr.bf16.mxu1 %v4664_v28  ;;  %v575_v29 = vlaneseq }
 0x1ff   :  { %2966 = vmatpush1.bf16.msra.mxu0 %v4390_v30  ;;  %v576_v30 = vshrl.u32 %v575_v29, 7 }
 0x200   :  { %2978 = vmatprep.subr.bf16.mxu0 %v4395_v33 }
 0x201   :  { %v577_v31 = vsub.s32 0, %v576_v30  ;;  %v581_v33 = vsub.s32 1, %v576_v30 }
 0x202   :  { %2968 = vmatmul.mubr.bf16.vlgmr.msra.gmra.mrb[0].mxu0 %v185_v36 }
 0x203   :  { %2979 = vmatpush1.bf16.msra.mxu0 %v4393_v37  ;;  %3010 = vmatprep.mubr.bf16.mxu0 %v188_v38  ;;  %v578_v34 = vrot.slane %v573_v32, %v577_v31  ;;  %v582_v35 = vrot.slane %v573_v32, %v581_v33 }
 0x204   :  { %2980 = vmatprep.subr.bf16.mxu0 %v4398_v39 }
 0x207   :  { %2981 = vmatpush1.bf16.msra.mxu0 %v4396_v40 }
 0x208   :  { %2982 = vmatprep.subr.bf16.mxu0 %v4401_v41 }
 0x20b   :  { %2983 = vmatpush1.bf16.msra.mxu0 %v4399_v42 }
 0x20c   :  { %2984 = vmatprep.subr.bf16.mxu0 %v4404_v43 }
 0x20f   :  { %2985 = vmatpush1.bf16.msra.mxu0 %v4402_v44 }
 0x210   :  { %2986 = vmatprep.subr.bf16.mxu0 %v4407_v45 }
 0x213   :  { %2987 = vmatpush1.bf16.msra.mxu0 %v4405_v46 }
 0x214   :  { %2988 = vmatprep.subr.bf16.mxu0 %v4410_v47 }
 0x217   :  { %2989 = vmatpush1.bf16.msra.mxu0 %v4408_v48 }
 0x218   :  { %2990 = vmatprep.subr.bf16.mxu0 %v4413_v49 }
 0x21b   :  { %2991 = vmatpush1.bf16.msra.mxu0 %v4411_v50 }
 0x21c   :  { %2992 = vmatprep.subr.bf16.mxu0 %v4416_v51 }
 0x21f   :  { %2993 = vmatpush1.bf16.msra.mxu0 %v4414_v55  ;;  %v4458_v55 = vld [vmem:[#allocation11 + $0x8] sm:$0xff]  }
 0x220   :  { %2994 = vmatprep.subr.bf16.mxu0 %v4419_v56  ;;  %v4459_v56 = vld [vmem:[#allocation11 + $0x10] sm:$0xff]  }
 0x223   :  { %2995 = vmatpush1.bf16.msra.mxu0 %v4417_v59  ;;  %v4462_v59 = vld [vmem:[#allocation11 + $0x28] sm:$0xff]  }
 0x224   :  { %2996 = vmatprep.subr.bf16.mxu0 %v4422_v60  ;;  %v4463_v60 = vld [vmem:[#allocation11 + $0x30] sm:$0xff]  }
 0x227   :  { %2997 = vmatpush1.bf16.msra.mxu0 %v4420_v63  ;;  %v3724_v63 = vld [vmem:[#allocation10] ss:$0 sm:$0xff] }
 0x228   :  { %2998 = vmatprep.subr.bf16.mxu0 %v4425_v0 }
 0x22b   :  { %2999 = vmatpush1.bf16.msra.mxu0 %v4423_v3 }
 0x22c   :  { %3000 = vmatprep.subr.bf16.mxu0 %v4428_v4 }
 0x22f   :  { %3001 = vmatpush1.bf16.msra.mxu0 %v4426_v7 }
 0x230   :  { %3002 = vmatprep.subr.bf16.mxu0 %v4431_v8 }
 0x233   :  { %3003 = vmatpush1.bf16.msra.mxu0 %v4429_v9 }
 0x234   :  { %3004 = vmatprep.subr.bf16.mxu0 %v4434_v10  ;;  %v3741_v10 = vld [vmem:[#allocation13] ss:$0 sm:$0xff] }
 0x237   :  { %3005 = vmatpush1.bf16.msra.mxu0 %v4432_v11 }
 0x238   :  { %3006 = vmatprep.subr.bf16.mxu0 %v4437_v12 }
 0x23b   :  { %3007 = vmatpush1.bf16.msra.mxu0 %v4435_v13 }
 0x23c   :  { %3008 = vmatprep.subr.bf16.mxu0 %v4440_v14 }
 0x23f   :  { %3009 = vmatpush1.bf16.msra.mxu0 %v4438_v15 }
 0x242   :  { %3011 = vmatmul.mubr.bf16.vlgmr.msra.gmra.mrb[0].mxu0 %v187_v18 }
 0x294   :  { %v2711_v20 = vpop.f32.mrb[0].mxu1 }
 0x295   :  { %v2713_v21 = vpop.f32.mrb[1].mxu1  ;;  %v3801_v36 = vadd.f32 %v2711_v20, %v578_v34 }
 0x296   :  { %v2715_v23 = vpop.f32.mrb[2].mxu1  ;;  %v3803_v37 = vadd.f32 %v2713_v21, %v582_v35 }
 0x297   :  { %v2717_v25 = vpop.f32.mrb[3].mxu1  ;;  %v3805_v39 = vadd.f32 %v2715_v23, %v578_v34 }
 0x298   :  { %v3807_v42 = vadd.f32 %v2717_v25, %v582_v35 }
 0x315   :  { %v3012_v38 = vpop.f32.mrb[0].mxu0 }
 0x316   :  { %v3802_v40 = vadd.f32 %v3801_v36, %v3012_v38  ;;  %v3014_v41 = vpop.f32.mrb[1].mxu0 }
 0x317   :  { %v3804_v43 = vadd.f32 %v3803_v37, %v3014_v41  ;;  %v3016_v44 = vpop.f32.mrb[2].mxu0 }
 0x318   :  { %v3806_v45 = vadd.f32 %v3805_v39, %v3016_v44  ;;  %v3018_v46 = vpop.f32.mrb[3].mxu0  ;;  %v3021_v48 = vmax.f32 %v3802_v40, 0.0 }
 0x319   :  { %v3808_v47 = vadd.f32 %v3807_v42, %v3018_v46  ;;  %v3022_v50 = vmax.f32 %v3804_v43, 0.0 }
 0x31a   :  { %v3023_v49 = vmax.f32 %v3806_v45, 0.0 }
 0x31b   :  { %v3024_v51 = vmax.f32 %v3808_v47, 0.0 }
 0x31c   :  { %v3025_v52 = vpack.c.bf16 %v3023_v49, %v3021_v48 }
 0x31d   :  { %v3026_v53 = vpack.c.bf16 %v3024_v51, %v3022_v50 }
 0x31f   :  { %3194 = vmatprep.mubr.bf16.mxu1 %v3026_v53 }
 0x320   :  { %3195 = vmatmul.mubr.bf16.vlgmr.msra.gmra.mrb[4].mxu1 %v3025_v52 }
 0x321   :  { %3782 = vmatpush3.bf16.msra.mxu1 %v4457_v54  ;;  %3797 = vmatprep.mubr.msk.bf16.mxu1 %vm4665_vm0, %v4664_v28 }
 0x322   :  { %3783 = vmatprep.subr.bf16.mxu1 %v4664_v28 }
 0x325   :  { %3784 = vmatpush3.bf16.msra.mxu1 %v4458_v55 }
 0x326   :  { %3785 = vmatprep.subr.bf16.mxu1 %v4664_v28 }
 0x329   :  { %3786 = vmatpush3.bf16.msra.mxu1 %v4459_v56 }
 0x32a   :  { %3787 = vmatprep.subr.bf16.mxu1 %v4664_v28 }
 0x32d   :  { %3788 = vmatpush3.bf16.msra.mxu1 %v4460_v57 }
 0x32e   :  { %3789 = vmatprep.subr.bf16.mxu1 %v4664_v28 }
 0x331   :  { %3790 = vmatpush3.bf16.msra.mxu1 %v4461_v58 }
 0x332   :  { %3791 = vmatprep.subr.bf16.mxu1 %v4664_v28 }
 0x335   :  { %3792 = vmatpush3.bf16.msra.mxu1 %v4462_v59 }
 0x336   :  { %3793 = vmatprep.subr.bf16.mxu1 %v4664_v28 }
 0x339   :  { %3794 = vmatpush3.bf16.msra.mxu1 %v4463_v60 }
 0x33a   :  { %3795 = vmatprep.subr.bf16.mxu1 %v4664_v28 }
 0x33d   :  { %3796 = vmatpush3.bf16.msra.mxu1 %v4464_v61 }
 0x3f3   :  { %v3766_v62 = vpop.f32.mrb[4].mxu1 }
 0x3f4   :  { %v3767_v0 = vpop.f32.mrb[5].mxu1 }
 0x3f5   :  { %v3768_v1 = vadd.f32 %v3767_v0, %v3766_v62  ;;  %v3769_v2 = vpop.f32.mrb[6].mxu1 }
 0x3f6   :  { %v3770_v3 = vpop.f32.mrb[7].mxu1 }
 0x3f7   :  { %v3197_v4 = vadd.f32 %v3768_v1, %v3724_v63  ;;  %v3771_v5 = vadd.f32 %v3770_v3, %v3769_v2 }
 0x3f9   :  { %v3200_v6 = vadd.f32 %v3771_v5, %v3724_v63  ;;  %v3203_v7 = vmax.f32 %v3197_v4, 0.0 }
 0x3fb   :  { %v3204_v8 = vmax.f32 %v3200_v6, 0.0 }
 0x3fd   :  { %v3205_v9 = vpack.c.bf16 %v3204_v8, %v3203_v7 }
 0x3ff   :  { %3798 = vmatmul.mubr.bf16.vlgmr.msra.gmra.mrb[8].mxu1 %v3205_v9 }
 0x4d2   :  { %v3311_v11 = vpop.f32.mrb[8].mxu1 }
 0x4d3   :  { %v3312_v12 = vadd.f32 %v3741_v10, %v3311_v11  ;;  %v3799_v13 = vpop.f32.mrb[9].mxu1 }
 0x4d4   :  { %v3314_v14 = vpop.f32.mrb[10].mxu1 }
 0x4d5   :  { %3318 = vst [vmem:[#allocation14] sm:$0xff] %v3312_v12  ;;  %v3315_v15 = vadd.f32 %v3741_v10, %v3314_v14  ;;  %v3800_v16 = vpop.f32.mrb[11].mxu1 }
 0x4d7   :  { %3319 = vst [vmem:[#allocation14 + $0x8] sm:$0xff] %v3315_v15 }
 0x4d8   :  { %4630 = shalt.err (!%p4627_p4)
}
 0x4d9   :  { %s4631_s22 = scalar_lea.hbm %s4823_s7, 256 }
 0x4da   :  { %p4632_p5 = scmp.ne.s32.totalorder %s4823_s7, %s4631_s22  ;;  %p4635_p6 = scmp.lt.u32.totalorder %s4631_s22, %s4823_s7 }
 0x4dc   :  { %p4637_p7 = pnand %p4635_p6, %p4632_p5 }
 0x4de   :  { %4640 = shalt.err (!%p4637_p7)
}
 0x4df   :  { %3331 = dma.vmem_to_hbm [thread:$0]  %s3326_s0, 256, %s4823_s7, [#allocation4], %s4652_s11, %s4652_s11, %s4653_s12  }
 0x4e0   :  { %4649 = dma.done.wait [#allocation4], 256  }
 0x4e1   :  { %4650 = vsyncadd [#allocation4], 4294967040 }
 0x4e2   :  { %3335 = vsyncpa [#allocation3], 1 }
 0x4e3   :  { %3336 = vsyncpa [#allocation6], 1 }
 0x4e4   :  { %3337 = vsyncpa [#allocation9], 1 }
 0x4e5   :  { %3338 = vsyncpa [#allocation12], 1 }
 0x4e6   :  { %3339 = vsyncpa [#allocation4], 1 }

</bundles_post_ra>
